<compile_context>
chip_gen: v7x
topology: tpu7x:2x2x1
jax: 0.10.0
libtpu: 0.0.40
codegen_flags: <defaults>
</compile_context>

<pallas_src>
import jax
import jax.numpy as jnp
from jax.experimental import pallas as pl
from jax.experimental.pallas import tpu as pltpu

# Constants from the original repo (chosen deterministically here).
FN_DROPOUT_P = 0.5              # dropout is identity in eval mode
FN_LRELU_NEGATIVE_SLOPE = 0.1
FN_INPUT_DIM = 16               # conv1 kernel height == input height
BN_EPS = 1e-5

KIN = FN_INPUT_DIM * 3          # 48 real input values per example (H*W)
NOUT_PAD = 128                  # lane-dense output head width (11 real columns)


def _lrelu(v):
    return jnp.where(v >= 0, v, FN_LRELU_NEGATIVE_SLOPE * v)


def _round_up(n, m):
    return (n + m - 1) // m * m


def _choose_tb(B):
    """Batch tile: >=2 grid steps for B>8 (v7x megacore), capped for VMEM."""
    if B <= 8:
        return 8
    return min(1024, _round_up((B + 1) // 2, 8))


# ----------------------------------------------------------------------------- kernel
def fightnet_kernel(xcol_ref, w1_ref, w2_ref, wf_ref, wout_ref, bout_ref,
                    v768_ref, v256_ref, out_ref):
    """One batch tile: (TB, 48) flattened inputs -> (TB, 128) lane-padded head."""
    v768 = v768_ref[...]     # (2, 768):  conv1-BN scale / shift (channels tiled x3 taps)
    v256 = v256_ref[...]     # (16, 256): bn2 s/sh, then (bias, bn_s, bn_sh) x 3 fc blocks

    # conv1 (pad folded into the weight) over all 3 width taps as ONE bf16 matmul:
    #   (TB, 48) @ (48, 768) -> (TB, 768) f32, columns ordered tap-major (w*256 + c).
    y = jnp.dot(xcol_ref[...], w1_ref[...], preferred_element_type=jnp.float32)
    y = _lrelu(y * v768[0:1, :] + v768[1:2, :])          # BatchNorm2d(256), eval
    # dropout: identity (eval mode)

    # permute(0,2,1,3) + conv2 collapses to ONE K=768 matmul.
    h = jnp.dot(y.astype(jnp.bfloat16), w2_ref[...],
                preferred_element_type=jnp.float32)
    h = _lrelu(h * v256[0:1, :] + v256[1:2, :])          # BatchNorm1d(256), eval

    # three residual fc blocks: x = lrelu(bn(x + fc(x)))
    for i in range(3):
        b = v256[2 + 3 * i:3 + 3 * i, :]
        s = v256[3 + 3 * i:4 + 3 * i, :]
        t = v256[4 + 3 * i:5 + 3 * i, :]
        h = h + (jnp.dot(h.astype(jnp.bfloat16), wf_ref[i],
                         preferred_element_type=jnp.float32) + b)
        h = _lrelu(h * s + t)

    # output head: 256 -> 11 (lane-padded to 128); log_softmax cols 0..8, sigmoid 9,10
    logits = jnp.dot(h.astype(jnp.bfloat16), wout_ref[...],
                     preferred_element_type=jnp.float32) + bout_ref[...]
    col = jax.lax.broadcasted_iota(jnp.int32, logits.shape, 1)
    sm_mask = col < 9
    masked = jnp.where(sm_mask, logits, jnp.float32(-1e30))
    m = jnp.max(masked, axis=1, keepdims=True)
    e = jnp.exp(masked - m)                               # masked lanes -> exp(-inf) = 0, no inf
    lse = m + jnp.log(jnp.sum(e, axis=1, keepdims=True))
    out_ref[...] = jnp.where(sm_mask, logits - lse, jax.nn.sigmoid(logits))


# ----------------------------------------------------------------------------- params
def init_params(key):
    keys = iter(jax.random.split(key, 32))

    def nrm(shape, scale=0.05):
        return scale * jax.random.normal(next(keys), shape, jnp.float32)

    def bn_params(c):
        gamma = 1.0 + 0.1 * jax.random.normal(next(keys), (c,), jnp.float32)
        beta = 0.1 * jax.random.normal(next(keys), (c,), jnp.float32)
        mean = 0.1 * jax.random.normal(next(keys), (c,), jnp.float32)
        var = 1.0 + 0.1 * jnp.abs(jax.random.normal(next(keys), (c,), jnp.float32))
        return (gamma, beta, mean, var)

    return {
        "conv1_w": nrm((256, 1, FN_INPUT_DIM, 3)),
        "bn_c1": bn_params(256),
        "conv2_w": nrm((256, 1, 256, 3)),
        "bn_c2": bn_params(256),
        "fc1": (nrm((256, 256)), nrm((256,))),
        "bn_fc1": bn_params(256),
        "fc2": (nrm((256, 256)), nrm((256,))),
        "bn_fc2": bn_params(256),
        "fc3": (nrm((256, 256)), nrm((256,))),
        "bn_fc3": bn_params(256),
        "out_fc": (nrm((11, 256)), nrm((11,))),
    }


def _fold_bn(p):
    gamma, beta, mean, var = p
    scale = gamma / jnp.sqrt(var + BN_EPS)
    shift = beta - mean * scale
    return scale, shift


def _prep_weights(params):
    """Host-side weight re-layout (done once per parameter set)."""
    # conv1 + left pad (2,0) folded into one dense (48, 768) weight:
    #   rows indexed h*3 + j  (j = original input width column 0..2)
    #   cols indexed w*256 + c (tap-major).  Tap w reads input col j via
    #   kernel tap kw = j + 2 - w (valid only when 0 <= kw <= 2).
    Wc = params["conv1_w"][:, 0, :, :]                                # (256, 16, 3): [c, h, kw]
    w1_big = jnp.zeros((KIN, 3 * 256), jnp.float32)
    for w in range(3):
        for j in range(3):
            kw = j + 2 - w
            if 0 <= kw <= 2:
                w1_big = w1_big.at[j::3, w * 256:(w + 1) * 256].set(Wc[:, :, kw].T)

    # conv2 (after permute) -> (768, 256) with row index = w*256 + h, matching
    # y's tap-major column order.
    w2_big = jnp.transpose(params["conv2_w"][:, 0, :, :], (2, 1, 0)).reshape(3 * 256, 256)

    bn1s, bn1b = _fold_bn(params["bn_c1"])
    v768 = jnp.stack([jnp.tile(bn1s, 3), jnp.tile(bn1b, 3)])          # (2, 768)

    bn2s, bn2b = _fold_bn(params["bn_c2"])
    rows = [bn2s, bn2b]
    wf = []
    for i in (1, 2, 3):
        wi, bi = params[f"fc{i}"]
        si, ti = _fold_bn(params[f"bn_fc{i}"])
        wf.append(wi.T)
        rows += [bi, si, ti]
    rows += [jnp.zeros((256,), jnp.float32)] * (16 - len(rows))
    v256 = jnp.stack(rows)                                            # (16, 256)
    wf_stack = jnp.stack(wf)                                          # (3, 256, 256)

    wout = jnp.zeros((256, NOUT_PAD), jnp.float32).at[:, :11].set(params["out_fc"][0].T)
    bout = jnp.zeros((1, NOUT_PAD), jnp.float32).at[0, :11].set(params["out_fc"][1])

    # bf16 matmul operands; BN/bias vectors stay f32 (elementwise path is f32).
    return (w1_big.astype(jnp.bfloat16), w2_big.astype(jnp.bfloat16),
            wf_stack.astype(jnp.bfloat16), wout.astype(jnp.bfloat16),
            bout, v768, v256)


# ----------------------------------------------------------------------------- wrapper
def fightnet_forward(params, x):
    B = x.shape[0]

    # conv1 as a K=48 matmul: row layout h*3 + j (exactly x.reshape(B, 48)).
    # bf16 cast here halves the streamed activation DMA; the dot accumulates f32.
    xcol = x.reshape(B, KIN).astype(jnp.bfloat16)

    TB = _choose_tb(B)
    Bpad = _round_up(B, TB)
    if Bpad != B:
        xcol = jnp.pad(xcol, ((0, Bpad - B), (0, 0)))

    w1_big, w2_big, wf_stack, wout, bout, v768, v256 = _prep_weights(params)

    weight_bytes = (int(w1_big.size + w2_big.size + wf_stack.size + wout.size) * 2
                    + int(bout.size + v768.size + v256.size) * 4)
    flops = 2 * Bpad * (KIN * 768 + 768 * 256 + 3 * 256 * 256 + 256 * NOUT_PAD)
    transcendentals = Bpad * (2 * NOUT_PAD + 1)           # exp + sigmoid lanes + log
    bytes_accessed = Bpad * KIN * 2 + Bpad * NOUT_PAD * 4 + weight_bytes

    const2 = lambda i: (0, 0)
    out = pl.pallas_call(
        fightnet_kernel,
        out_shape=jax.ShapeDtypeStruct((Bpad, NOUT_PAD), jnp.float32),
        grid=(Bpad // TB,),
        in_specs=[
            pl.BlockSpec((TB, KIN), lambda i: (i, 0)),     # activations: streamed per tile
            pl.BlockSpec((KIN, 3 * 256), const2),          # weights / BN: resident
            pl.BlockSpec((3 * 256, 256), const2),
            pl.BlockSpec((3, 256, 256), lambda i: (0, 0, 0)),
            pl.BlockSpec((256, NOUT_PAD), const2),
            pl.BlockSpec((1, NOUT_PAD), const2),
            pl.BlockSpec((2, 3 * 256), const2),
            pl.BlockSpec((16, 256), const2),
        ],
        out_specs=pl.BlockSpec((TB, NOUT_PAD), lambda i: (i, 0)),
        compiler_params=pltpu.CompilerParams(
            dimension_semantics=("parallel",),
            vmem_limit_bytes=32 * 1024 * 1024),
        cost_estimate=pl.CostEstimate(flops=flops,
                                      transcendentals=transcendentals,
                                      bytes_accessed=bytes_accessed),
    )(xcol, w1_big, w2_big, wf_stack, wout, bout, v768, v256)

    return out[:B, :11]


# ----------------------------------------------------------------------------- reference
def reference_forward(params, x):
    P = jax.lax.Precision.HIGHEST

    def bn1d(v, p):
        g, b, m, var = p
        return (v - m[None, :]) / jnp.sqrt(var[None, :] + BN_EPS) * g[None, :] + b[None, :]

    x = jnp.pad(x, ((0, 0), (0, 0), (0, 0), (2, 0)))
    x = jax.lax.conv_general_dilated(x, params["conv1_w"], (1, 1), "VALID",
                                     dimension_numbers=("NCHW", "OIHW", "NCHW"),
                                     precision=P)
    g, b, m, v = params["bn_c1"]
    x = ((x - m[None, :, None, None]) / jnp.sqrt(v[None, :, None, None] + BN_EPS)
         * g[None, :, None, None] + b[None, :, None, None])
    x = _lrelu(x)
    x = jnp.transpose(x, (0, 2, 1, 3))
    x = jax.lax.conv_general_dilated(x, params["conv2_w"], (1, 1), "VALID",
                                     dimension_numbers=("NCHW", "OIHW", "NCHW"),
                                     precision=P)
    x = x.reshape(x.shape[0], 256)
    x = _lrelu(bn1d(x, params["bn_c2"]))
    for i in (1, 2, 3):
        w, bias = params[f"fc{i}"]
        x = x + (jnp.dot(x, w.T, precision=P) + bias[None, :])
        x = _lrelu(bn1d(x, params[f"bn_fc{i}"]))
    w, bias = params["out_fc"]
    x = jnp.dot(x, w.T, precision=P) + bias[None, :]
    head = jax.nn.log_softmax(x[:, :9], axis=1)
    tail = jax.nn.sigmoid(x[:, 9:])
    return jnp.concatenate([head, tail], axis=1)


if __name__ == "__main__":
    key = jax.random.PRNGKey(0)
    pkey, xkey, xkey2 = jax.random.split(key, 3)
    params = init_params(pkey)

    # bf16 MXU operands (f32 accumulation) -> bf16-appropriate tolerance.
    ATOL = RTOL = 2e-2

    # primary small-shape check (B=2)
    B = 2
    x = jax.random.normal(xkey, (B, 1, FN_INPUT_DIM, 3), jnp.float32)
    out = jax.block_until_ready(fightnet_forward(params, x))
    assert out.shape == (B, 11), out.shape
    ref = reference_forward(params, x)
    assert jnp.allclose(out, ref, atol=ATOL, rtol=RTOL), (
        "max abs diff = %g" % float(jnp.max(jnp.abs(out - ref))))

    # exercise the multi-tile batch grid + padded tail (TB=264, grid=2)
    B2 = 520
    x2 = jax.random.normal(xkey2, (B2, 1, FN_INPUT_DIM, 3), jnp.float32)
    out2 = jax.block_until_ready(fightnet_forward(params, x2))
    ref2 = reference_forward(params, x2)
    assert out2.shape == (B2, 11), out2.shape
    assert jnp.allclose(out2, ref2, atol=ATOL, rtol=RTOL), (
        "max abs diff = %g" % float(jnp.max(jnp.abs(out2 - ref2))))

    print("KERNEL_OK")
</pallas_src>

<mosaic_0001>
module attributes {stable_mosaic.version = 11 : i64} {
  func.func @fightnet_kernel(%arg0: i32, %arg1: memref<8x48xbf16, #tpu.memory_space<vmem>>, %arg2: memref<48x768xbf16, #tpu.memory_space<vmem>>, %arg3: memref<768x256xbf16, #tpu.memory_space<vmem>>, %arg4: memref<3x256x256xbf16, #tpu.memory_space<vmem>>, %arg5: memref<256x128xbf16, #tpu.memory_space<vmem>>, %arg6: memref<1x128xf32, #tpu.memory_space<vmem>>, %arg7: memref<2x768xf32, #tpu.memory_space<vmem>>, %arg8: memref<16x256xf32, #tpu.memory_space<vmem>>, %arg9: memref<8x128xf32, #tpu.memory_space<vmem>>) attributes {dimension_semantics = [#tpu.dimension_semantics<parallel>], iteration_bounds = array<i64: 1>, scalar_prefetch = 0 : i64, scratch_operands = 0 : i64, tpu.core_type = #tpu.core_type<tc>, window_params = [{transform_indices = @transform_0, window_bounds = array<i64: 8, 48>}, {pipeline_mode = #tpu.pipeline_mode<synchronous>, transform_indices = @transform_1, window_bounds = array<i64: 48, 768>}, {pipeline_mode = #tpu.pipeline_mode<synchronous>, transform_indices = @transform_2, window_bounds = array<i64: 768, 256>}, {pipeline_mode = #tpu.pipeline_mode<synchronous>, transform_indices = @transform_3, window_bounds = array<i64: 3, 256, 256>}, {pipeline_mode = #tpu.pipeline_mode<synchronous>, transform_indices = @transform_4, window_bounds = array<i64: 256, 128>}, {pipeline_mode = #tpu.pipeline_mode<synchronous>, transform_indices = @transform_5, window_bounds = array<i64: 1, 128>}, {pipeline_mode = #tpu.pipeline_mode<synchronous>, transform_indices = @transform_6, window_bounds = array<i64: 2, 768>}, {pipeline_mode = #tpu.pipeline_mode<synchronous>, transform_indices = @transform_7, window_bounds = array<i64: 16, 256>}, {transform_indices = @transform_8, window_bounds = array<i64: 8, 128>}]} {
    %c0 = arith.constant 0 : index
    %c0_0 = arith.constant 0 : index
    %0 = vector.load %arg7[%c0, %c0_0] : memref<2x768xf32, #tpu.memory_space<vmem>>, vector<2x768xf32>
    %c0_1 = arith.constant 0 : index
    %c0_2 = arith.constant 0 : index
    %1 = vector.load %arg8[%c0_1, %c0_2] : memref<16x256xf32, #tpu.memory_space<vmem>>, vector<16x256xf32>
    %c0_3 = arith.constant 0 : index
    %c0_4 = arith.constant 0 : index
    %2 = vector.load %arg1[%c0_3, %c0_4] : memref<8x48xbf16, #tpu.memory_space<vmem>>, vector<8x48xbf16>
    %c0_5 = arith.constant 0 : index
    %c0_6 = arith.constant 0 : index
    %3 = vector.load %arg2[%c0_5, %c0_6] : memref<48x768xbf16, #tpu.memory_space<vmem>>, vector<48x768xbf16>
    %cst = arith.constant dense<0.000000e+00> : vector<8x768xf32>
    %4 = tpu.matmul %2, %3, %cst {dimension_numbers = #tpu.dot_dimension_numbers<[1], [0], [0], [1], [0, 0, 1, 1], [], []>} : vector<8x48xbf16>, vector<48x768xbf16>, vector<8x768xf32> -> vector<8x768xf32>
    %5 = vector.extract_strided_slice %0 {offsets = [0, 0], sizes = [1, 768], strides = [1, 1]} : vector<2x768xf32> to vector<1x768xf32>
    %6 = vector.broadcast %5 : vector<1x768xf32> to vector<8x768xf32>
    %7 = arith.mulf %4, %6 : vector<8x768xf32>
    %8 = vector.extract_strided_slice %0 {offsets = [1, 0], sizes = [1, 768], strides = [1, 1]} : vector<2x768xf32> to vector<1x768xf32>
    %9 = vector.broadcast %8 : vector<1x768xf32> to vector<8x768xf32>
    %10 = arith.addf %7, %9 : vector<8x768xf32>
    %cst_7 = arith.constant 0.000000e+00 : f32
    %11 = vector.broadcast %cst_7 : f32 to vector<8x768xf32>
    %12 = arith.cmpf oge, %10, %11 : vector<8x768xf32>
    %cst_8 = arith.constant 1.000000e-01 : f32
    %13 = vector.broadcast %cst_8 : f32 to vector<8x768xf32>
    %14 = arith.mulf %13, %10 : vector<8x768xf32>
    %15 = arith.select %12, %10, %14 : vector<8x768xi1>, vector<8x768xf32>
    %16 = arith.truncf %15 : vector<8x768xf32> to vector<8x768xbf16>
    %c0_9 = arith.constant 0 : index
    %c0_10 = arith.constant 0 : index
    %17 = vector.load %arg3[%c0_9, %c0_10] : memref<768x256xbf16, #tpu.memory_space<vmem>>, vector<768x256xbf16>
    %cst_11 = arith.constant dense<0.000000e+00> : vector<8x256xf32>
    %18 = tpu.matmul %16, %17, %cst_11 {dimension_numbers = #tpu.dot_dimension_numbers<[1], [0], [0], [1], [0, 0, 1, 1], [], []>} : vector<8x768xbf16>, vector<768x256xbf16>, vector<8x256xf32> -> vector<8x256xf32>
    %19 = vector.extract_strided_slice %1 {offsets = [0, 0], sizes = [1, 256], strides = [1, 1]} : vector<16x256xf32> to vector<1x256xf32>
    %20 = vector.broadcast %19 : vector<1x256xf32> to vector<8x256xf32>
    %21 = arith.mulf %18, %20 : vector<8x256xf32>
    %22 = vector.extract_strided_slice %1 {offsets = [1, 0], sizes = [1, 256], strides = [1, 1]} : vector<16x256xf32> to vector<1x256xf32>
    %23 = vector.broadcast %22 : vector<1x256xf32> to vector<8x256xf32>
    %24 = arith.addf %21, %23 : vector<8x256xf32>
    %cst_12 = arith.constant 0.000000e+00 : f32
    %25 = vector.broadcast %cst_12 : f32 to vector<8x256xf32>
    %26 = arith.cmpf oge, %24, %25 : vector<8x256xf32>
    %cst_13 = arith.constant 1.000000e-01 : f32
    %27 = vector.broadcast %cst_13 : f32 to vector<8x256xf32>
    %28 = arith.mulf %27, %24 : vector<8x256xf32>
    %29 = arith.select %26, %24, %28 : vector<8x256xi1>, vector<8x256xf32>
    %30 = vector.extract_strided_slice %1 {offsets = [2, 0], sizes = [1, 256], strides = [1, 1]} : vector<16x256xf32> to vector<1x256xf32>
    %31 = vector.extract_strided_slice %1 {offsets = [3, 0], sizes = [1, 256], strides = [1, 1]} : vector<16x256xf32> to vector<1x256xf32>
    %32 = vector.extract_strided_slice %1 {offsets = [4, 0], sizes = [1, 256], strides = [1, 1]} : vector<16x256xf32> to vector<1x256xf32>
    %33 = arith.truncf %29 : vector<8x256xf32> to vector<8x256xbf16>
    %c0_14 = arith.constant 0 : index
    %c0_15 = arith.constant 0 : index
    %c0_16 = arith.constant 0 : index
    %34 = vector.load %arg4[%c0_14, %c0_15, %c0_16] : memref<3x256x256xbf16, #tpu.memory_space<vmem>>, vector<1x256x256xbf16>
    %35 = vector.shape_cast %34 : vector<1x256x256xbf16> to vector<256x256xbf16>
    %cst_17 = arith.constant dense<0.000000e+00> : vector<8x256xf32>
    %36 = tpu.matmul %33, %35, %cst_17 {dimension_numbers = #tpu.dot_dimension_numbers<[1], [0], [0], [1], [0, 0, 1, 1], [], []>} : vector<8x256xbf16>, vector<256x256xbf16>, vector<8x256xf32> -> vector<8x256xf32>
    %37 = vector.broadcast %30 : vector<1x256xf32> to vector<8x256xf32>
    %38 = arith.addf %36, %37 : vector<8x256xf32>
    %39 = arith.addf %29, %38 : vector<8x256xf32>
    %40 = vector.broadcast %31 : vector<1x256xf32> to vector<8x256xf32>
    %41 = arith.mulf %39, %40 : vector<8x256xf32>
    %42 = vector.broadcast %32 : vector<1x256xf32> to vector<8x256xf32>
    %43 = arith.addf %41, %42 : vector<8x256xf32>
    %cst_18 = arith.constant 0.000000e+00 : f32
    %44 = vector.broadcast %cst_18 : f32 to vector<8x256xf32>
    %45 = arith.cmpf oge, %43, %44 : vector<8x256xf32>
    %cst_19 = arith.constant 1.000000e-01 : f32
    %46 = vector.broadcast %cst_19 : f32 to vector<8x256xf32>
    %47 = arith.mulf %46, %43 : vector<8x256xf32>
    %48 = arith.select %45, %43, %47 : vector<8x256xi1>, vector<8x256xf32>
    %49 = vector.extract_strided_slice %1 {offsets = [5, 0], sizes = [1, 256], strides = [1, 1]} : vector<16x256xf32> to vector<1x256xf32>
    %50 = vector.extract_strided_slice %1 {offsets = [6, 0], sizes = [1, 256], strides = [1, 1]} : vector<16x256xf32> to vector<1x256xf32>
    %51 = vector.extract_strided_slice %1 {offsets = [7, 0], sizes = [1, 256], strides = [1, 1]} : vector<16x256xf32> to vector<1x256xf32>
    %52 = arith.truncf %48 : vector<8x256xf32> to vector<8x256xbf16>
    %c1 = arith.constant 1 : index
    %c0_20 = arith.constant 0 : index
    %c0_21 = arith.constant 0 : index
    %53 = vector.load %arg4[%c1, %c0_20, %c0_21] : memref<3x256x256xbf16, #tpu.memory_space<vmem>>, vector<1x256x256xbf16>
    %54 = vector.shape_cast %53 : vector<1x256x256xbf16> to vector<256x256xbf16>
    %cst_22 = arith.constant dense<0.000000e+00> : vector<8x256xf32>
    %55 = tpu.matmul %52, %54, %cst_22 {dimension_numbers = #tpu.dot_dimension_numbers<[1], [0], [0], [1], [0, 0, 1, 1], [], []>} : vector<8x256xbf16>, vector<256x256xbf16>, vector<8x256xf32> -> vector<8x256xf32>
    %56 = vector.broadcast %49 : vector<1x256xf32> to vector<8x256xf32>
    %57 = arith.addf %55, %56 : vector<8x256xf32>
    %58 = arith.addf %48, %57 : vector<8x256xf32>
    %59 = vector.broadcast %50 : vector<1x256xf32> to vector<8x256xf32>
    %60 = arith.mulf %58, %59 : vector<8x256xf32>
    %61 = vector.broadcast %51 : vector<1x256xf32> to vector<8x256xf32>
    %62 = arith.addf %60, %61 : vector<8x256xf32>
    %cst_23 = arith.constant 0.000000e+00 : f32
    %63 = vector.broadcast %cst_23 : f32 to vector<8x256xf32>
    %64 = arith.cmpf oge, %62, %63 : vector<8x256xf32>
    %cst_24 = arith.constant 1.000000e-01 : f32
    %65 = vector.broadcast %cst_24 : f32 to vector<8x256xf32>
    %66 = arith.mulf %65, %62 : vector<8x256xf32>
    %67 = arith.select %64, %62, %66 : vector<8x256xi1>, vector<8x256xf32>
    %68 = vector.extract_strided_slice %1 {offsets = [8, 0], sizes = [1, 256], strides = [1, 1]} : vector<16x256xf32> to vector<1x256xf32>
    %69 = vector.extract_strided_slice %1 {offsets = [9, 0], sizes = [1, 256], strides = [1, 1]} : vector<16x256xf32> to vector<1x256xf32>
    %70 = vector.extract_strided_slice %1 {offsets = [10, 0], sizes = [1, 256], strides = [1, 1]} : vector<16x256xf32> to vector<1x256xf32>
    %71 = arith.truncf %67 : vector<8x256xf32> to vector<8x256xbf16>
    %c2 = arith.constant 2 : index
    %c0_25 = arith.constant 0 : index
    %c0_26 = arith.constant 0 : index
    %72 = vector.load %arg4[%c2, %c0_25, %c0_26] : memref<3x256x256xbf16, #tpu.memory_space<vmem>>, vector<1x256x256xbf16>
    %73 = vector.shape_cast %72 : vector<1x256x256xbf16> to vector<256x256xbf16>
    %cst_27 = arith.constant dense<0.000000e+00> : vector<8x256xf32>
    %74 = tpu.matmul %71, %73, %cst_27 {dimension_numbers = #tpu.dot_dimension_numbers<[1], [0], [0], [1], [0, 0, 1, 1], [], []>} : vector<8x256xbf16>, vector<256x256xbf16>, vector<8x256xf32> -> vector<8x256xf32>
    %75 = vector.broadcast %68 : vector<1x256xf32> to vector<8x256xf32>
    %76 = arith.addf %74, %75 : vector<8x256xf32>
    %77 = arith.addf %67, %76 : vector<8x256xf32>
    %78 = vector.broadcast %69 : vector<1x256xf32> to vector<8x256xf32>
    %79 = arith.mulf %77, %78 : vector<8x256xf32>
    %80 = vector.broadcast %70 : vector<1x256xf32> to vector<8x256xf32>
    %81 = arith.addf %79, %80 : vector<8x256xf32>
    %cst_28 = arith.constant 0.000000e+00 : f32
    %82 = vector.broadcast %cst_28 : f32 to vector<8x256xf32>
    %83 = arith.cmpf oge, %81, %82 : vector<8x256xf32>
    %cst_29 = arith.constant 1.000000e-01 : f32
    %84 = vector.broadcast %cst_29 : f32 to vector<8x256xf32>
    %85 = arith.mulf %84, %81 : vector<8x256xf32>
    %86 = arith.select %83, %81, %85 : vector<8x256xi1>, vector<8x256xf32>
    %87 = arith.truncf %86 : vector<8x256xf32> to vector<8x256xbf16>
    %c0_30 = arith.constant 0 : index
    %c0_31 = arith.constant 0 : index
    %88 = vector.load %arg5[%c0_30, %c0_31] : memref<256x128xbf16, #tpu.memory_space<vmem>>, vector<256x128xbf16>
    %cst_32 = arith.constant dense<0.000000e+00> : vector<8x128xf32>
    %89 = tpu.matmul %87, %88, %cst_32 {dimension_numbers = #tpu.dot_dimension_numbers<[1], [0], [0], [1], [0, 0, 1, 1], [], []>} : vector<8x256xbf16>, vector<256x128xbf16>, vector<8x128xf32> -> vector<8x128xf32>
    %c0_33 = arith.constant 0 : index
    %c0_34 = arith.constant 0 : index
    %90 = vector.load %arg6[%c0_33, %c0_34] : memref<1x128xf32, #tpu.memory_space<vmem>>, vector<1x128xf32>
    %91 = vector.broadcast %90 : vector<1x128xf32> to vector<8x128xf32>
    %92 = arith.addf %89, %91 : vector<8x128xf32>
    %93 = tpu.iota {dimensions = array<i32: 1>} : vector<8x128xi32>
    %c9_i32 = arith.constant 9 : i32
    %94 = vector.broadcast %c9_i32 : i32 to vector<8x128xi32>
    %95 = arith.cmpi slt, %93, %94 : vector<8x128xi32>
    %cst_35 = arith.constant -1.000000e+30 : f32
    %96 = vector.broadcast %cst_35 : f32 to vector<8x128xf32>
    %97 = arith.select %95, %92, %96 : vector<8x128xi1>, vector<8x128xf32>
    %cst_36 = arith.constant dense<0xFF800000> : vector<8xf32>
    %98 = vector.multi_reduction <maximumf>, %97, %cst_36 [1] : vector<8x128xf32> to vector<8xf32>
    %99 = vector.shape_cast %98 : vector<8xf32> to vector<8x1xf32>
    %100 = vector.broadcast %99 : vector<8x1xf32> to vector<8x128xf32>
    %101 = arith.subf %97, %100 : vector<8x128xf32>
    %102 = math.exp %101 : vector<8x128xf32>
    %cst_37 = arith.constant dense<0.000000e+00> : vector<8xf32>
    %103 = vector.multi_reduction <add>, %102, %cst_37 [1] : vector<8x128xf32> to vector<8xf32>
    %104 = vector.shape_cast %103 : vector<8xf32> to vector<8x1xf32>
    %105 = math.log %104 : vector<8x1xf32>
    %106 = arith.addf %99, %105 : vector<8x1xf32>
    %107 = vector.broadcast %106 : vector<8x1xf32> to vector<8x128xf32>
    %108 = arith.subf %92, %107 : vector<8x128xf32>
    %109 = arith.negf %92 : vector<8x128xf32>
    %110 = math.exp %109 : vector<8x128xf32>
    %cst_38 = arith.constant 1.000000e+00 : f32
    %111 = vector.broadcast %cst_38 : f32 to vector<8x128xf32>
    %112 = arith.addf %111, %110 : vector<8x128xf32>
    %113 = arith.divf %111, %112 : vector<8x128xf32>
    %114 = arith.select %95, %108, %113 : vector<8x128xi1>, vector<8x128xf32>
    %c0_39 = arith.constant 0 : index
    %c0_40 = arith.constant 0 : index
    %115 = vector.load %arg9[%c0_39, %c0_40] : memref<8x128xf32, #tpu.memory_space<vmem>>, vector<8x128xf32>
    tpu.vector_store %arg9[%c0_39, %c0_40], %114 {strides = array<i32>} : memref<8x128xf32, #tpu.memory_space<vmem>>, vector<8x128xf32>,
    return
  }
  func.func @transform_0(%arg0: i32) -> (i32, i32) {
    %c0_i32 = arith.constant 0 : i32
    %c0_i32_0 = arith.constant 0 : i32
    return %arg0, %c0_i32 : i32, i32
  }
  func.func @transform_1(%arg0: i32) -> (i32, i32) {
    %c0_i32 = arith.constant 0 : i32
    %c0_i32_0 = arith.constant 0 : i32
    %c0_i32_1 = arith.constant 0 : i32
    return %c0_i32, %c0_i32_0 : i32, i32
  }
  func.func @transform_2(%arg0: i32) -> (i32, i32) {
    %c0_i32 = arith.constant 0 : i32
    %c0_i32_0 = arith.constant 0 : i32
    %c0_i32_1 = arith.constant 0 : i32
    return %c0_i32, %c0_i32_0 : i32, i32
  }
  func.func @transform_3(%arg0: i32) -> (i32, i32, i32) {
    %c0_i32 = arith.constant 0 : i32
    %c0_i32_0 = arith.constant 0 : i32
    %c0_i32_1 = arith.constant 0 : i32
    %c0_i32_2 = arith.constant 0 : i32
    return %c0_i32, %c0_i32_0, %c0_i32_1 : i32, i32, i32
  }
  func.func @transform_4(%arg0: i32) -> (i32, i32) {
    %c0_i32 = arith.constant 0 : i32
    %c0_i32_0 = arith.constant 0 : i32
    %c0_i32_1 = arith.constant 0 : i32
    return %c0_i32, %c0_i32_0 : i32, i32
  }
  func.func @transform_5(%arg0: i32) -> (i32, i32) {
    %c0_i32 = arith.constant 0 : i32
    %c0_i32_0 = arith.constant 0 : i32
    %c0_i32_1 = arith.constant 0 : i32
    return %c0_i32, %c0_i32_0 : i32, i32
  }
  func.func @transform_6(%arg0: i32) -> (i32, i32) {
    %c0_i32 = arith.constant 0 : i32
    %c0_i32_0 = arith.constant 0 : i32
    %c0_i32_1 = arith.constant 0 : i32
    return %c0_i32, %c0_i32_0 : i32, i32
  }
  func.func @transform_7(%arg0: i32) -> (i32, i32) {
    %c0_i32 = arith.constant 0 : i32
    %c0_i32_0 = arith.constant 0 : i32
    %c0_i32_1 = arith.constant 0 : i32
    return %c0_i32, %c0_i32_0 : i32, i32
  }
  func.func @transform_8(%arg0: i32) -> (i32, i32) {
    %c0_i32 = arith.constant 0 : i32
    %c0_i32_0 = arith.constant 0 : i32
    return %arg0, %c0_i32 : i32, i32
  }
}

</mosaic_0001>

<bundles_post_ra>
// kernel: tpu_custom_call.1
= control target key start
LH: loop header
LB: loop body
LE: loop exit
PB: predicated region body
PF: predicated region fallthrough
CT: control target
= control target key end

     0   :  { %13 = vsyncpa [#allocation3], 0  ;;  %s3343_s0 = inlined_call_operand.hbm [shape: bf16[8,48], index: 0, kind: input, shape index: {}]   ;;  %s3344_s1 = inlined_call_operand.hbm [shape: bf16[48,768], index: 1, kind: input, shape index: {}]   ;;  %s3345_s2 = inlined_call_operand.hbm [shape: bf16[768,256], index: 2, kind: input, shape index: {}]   ;;  %s3346_s3 = inlined_call_operand.hbm [shape: bf16[3,256,256], index: 3, kind: input, shape index: {}]   ;;  %s3347_s4 = inlined_call_operand.hbm [shape: bf16[256,128], index: 4, kind: input, shape index: {}]   ;;  %s3348_s5 = inlined_call_operand.vmem [shape: f32[1,128], index: 5, kind: input, shape index: {}]   ;;  %s3349_s6 = inlined_call_operand.vmem [shape: f32[2,768], index: 6, kind: input, shape index: {}]   ;;  %s3350_s7 = inlined_call_operand.hbm [shape: f32[16,256], index: 7, kind: input, shape index: {}]   ;;  %s3351_s8 = inlined_call_operand.hbm [shape: f32[8,128], index: 8, kind: output, shape index: {}]  }
   0x1   :  { %14 = vsyncpa [#allocation6], 0 }
   0x2   :  { %15 = vsyncpa [#allocation9], 0 }
   0x3   :  { %16 = vsyncpa [#allocation12], 0 }
   0x4   :  { %17 = vsyncpa [#allocation4], 0  ;;  %s3037_s27 = smov [#allocation5]   ;;  %s2873_s9 = scalar_lea.hbm %s3344_s1, 2304 }
   0x5   :  { %s33_s28 = sshll.u32 %s3037_s27, 4  ;;  %p2874_p0 = scmp.ne.s32.totalorder %s3344_s1, %s2873_s9  ;;  %s34_s28 = int_to_ptr.vmem [resolvable:$true] %s33_s28 }
   0x6   :  { %p2877_p1 = scmp.lt.u32.totalorder %s2873_s9, %s3344_s1 }
   0x8   :  { %p2879_p2 = pnand %p2877_p1, %p2874_p0 }
   0xa   :  { %2882 = shalt.err (!%p2879_p2)
}
   0xb   :  { %s2883_s14 = scalar_lea.vmem %s34_s28, 2304  ;;  %p2888_p4 = scmp.lt.s32.totalorder %s34_s28, %s34_s28 }
   0xc   :  { %p2884_p3 = scmp.ne.s32.totalorder %s34_s28, %s2883_s14  ;;  %p2889_p5 = scmp.lt.s32.totalorder %s2883_s14, %s2883_s14 }
   0xe   :  { %p2890_p6 = por %p2889_p5, %p2888_p4 }
  0x10   :  { %p2891_p7 = pnand %p2890_p6, %p2884_p3 }
  0x12   :  { %2894 = shalt.err (!%p2891_p7)
}
  0x13   :  { %s3038_s15 = smov 384   ;;  %s3039_s16 = smov 24  }
  0x14   :  { %39 = dma.hbm_to_vmem [thread:$0]  %s3344_s1, 2304, %s34_s28, [#allocation6], %s3038_s15, %s3038_s15, %s3039_s16  }
  0x15   :  { %s3040_s19 = smov [#allocation8]   ;;  %s3041_s21 = smov [#allocation2]  }
  0x16   :  { %s57_s20 = sshll.u32 %s3040_s19, 4  ;;  %s24_s22 = sshll.u32 %s3041_s21, 4  ;;  %s58_s20 = int_to_ptr.vmem [resolvable:$true] %s57_s20  ;;  %s25_s22 = int_to_ptr.vmem [resolvable:$true] %s24_s22 }
  0x17   :  { %s2895_s25 = scalar_lea.hbm %s3346_s3, 12288 }
  0x18   :  { %p2896_p8 = scmp.ne.s32.totalorder %s3346_s3, %s2895_s25  ;;  %p2899_p9 = scmp.lt.u32.totalorder %s2895_s25, %s3346_s3 }
  0x1a   :  { %p2901_p10 = pnand %p2899_p9, %p2896_p8 }
  0x1c   :  { %2904 = shalt.err (!%p2901_p10)
}
  0x1d   :  { %s2905_s1 = scalar_lea.vmem %s58_s20, 12288  ;;  %p2910_p12 = scmp.lt.s32.totalorder %s58_s20, %s58_s20 }
  0x1e   :  { %p2906_p11 = scmp.ne.s32.totalorder %s58_s20, %s2905_s1  ;;  %p2911_p13 = scmp.lt.s32.totalorder %s2905_s1, %s2905_s1 }
  0x20   :  { %p2912_p0 = por %p2911_p13, %p2910_p12 }
  0x22   :  { %p2913_p1 = pnand %p2912_p0, %p2906_p11 }
  0x24   :  { %2916 = shalt.err (!%p2913_p1)
}
  0x25   :  { %s3042_s28 = smov 128   ;;  %s3043_s9 = smov 8  }
  0x26   :  { %63 = dma.hbm_to_vmem [thread:$0]  %s3346_s3, 12288, %s58_s20, [#allocation9], %s3042_s28, %s3042_s28, %s3043_s9  }
  0x27   :  { %s2917_s14 = scalar_lea.hbm %s3343_s0, 64 }
  0x28   :  { %p2918_p2 = scmp.ne.s32.totalorder %s3343_s0, %s2917_s14  ;;  %p2921_p3 = scmp.lt.u32.totalorder %s2917_s14, %s3343_s0 }
  0x2a   :  { %p2923_p4 = pnand %p2921_p3, %p2918_p2 }
  0x2c   :  { %2926 = shalt.err (!%p2923_p4)
}
  0x2d   :  { %s2927_s19 = scalar_lea.vmem %s25_s22, 64  ;;  %p2932_p6 = scmp.lt.s32.totalorder %s25_s22, %s25_s22 }
  0x2e   :  { %p2928_p5 = scmp.ne.s32.totalorder %s25_s22, %s2927_s19  ;;  %p2933_p7 = scmp.lt.s32.totalorder %s2927_s19, %s2927_s19 }
  0x30   :  { %p2934_p8 = por %p2933_p7, %p2932_p6 }
  0x32   :  { %p2935_p9 = pnand %p2934_p8, %p2928_p5 }
  0x34   :  { %2938 = shalt.err (!%p2935_p9)
}
  0x35   :  { %27 = dma.hbm_to_vmem [thread:$0]  %s3343_s0, 64, %s25_s22, [#allocation3]  }
  0x36   :  { %s3044_s21 = smov [#allocation7]   ;;  %s3045_s24 = smov [#allocation10]  }
  0x37   :  { %s45_s23 = sshll.u32 %s3044_s21, 4  ;;  %s69_s25 = sshll.u32 %s3045_s24, 4  ;;  %s46_s23 = int_to_ptr.vmem [resolvable:$true] %s45_s23  ;;  %s70_s25 = int_to_ptr.vmem [resolvable:$true] %s69_s25 }
  0x38   :  { %s2939_s29 = scalar_lea.hbm %s3345_s2, 12288 }
  0x39   :  { %p2940_p10 = scmp.ne.s32.totalorder %s3345_s2, %s2939_s29  ;;  %p2943_p11 = scmp.lt.u32.totalorder %s2939_s29, %s3345_s2 }
  0x3b   :  { %p2945_p12 = pnand %p2943_p11, %p2940_p10 }
  0x3d   :  { %2948 = shalt.err (!%p2945_p12)
}
  0x3e   :  { %s2949_s0 = scalar_lea.vmem %s46_s23, 12288  ;;  %p2954_p0 = scmp.lt.s32.totalorder %s46_s23, %s46_s23 }
  0x3f   :  { %p2950_p13 = scmp.ne.s32.totalorder %s46_s23, %s2949_s0  ;;  %p2955_p1 = scmp.lt.s32.totalorder %s2949_s0, %s2949_s0 }
  0x41   :  { %p2956_p2 = por %p2955_p1, %p2954_p0 }
  0x43   :  { %p2957_p3 = pnand %p2956_p2, %p2950_p13 }
  0x45   :  { %2960 = shalt.err (!%p2957_p3)
}
  0x46   :  { %51 = dma.hbm_to_vmem [thread:$0]  %s3345_s2, 12288, %s46_s23, [#allocation6], %s3042_s28, %s3042_s28, %s3043_s9  }
  0x47   :  { %s2961_s15 = scalar_lea.hbm %s3347_s4, 2048 }
  0x48   :  { %p2962_p4 = scmp.ne.s32.totalorder %s3347_s4, %s2961_s15  ;;  %p2965_p5 = scmp.lt.u32.totalorder %s2961_s15, %s3347_s4 }
  0x4a   :  { %p2967_p6 = pnand %p2965_p5, %p2962_p4 }
  0x4c   :  { %2970 = shalt.err (!%p2967_p6)
}
  0x4d   :  { %s2971_s3 = scalar_lea.vmem %s70_s25, 2048  ;;  %p2976_p8 = scmp.lt.s32.totalorder %s70_s25, %s70_s25 }
  0x4e   :  { %p2972_p7 = scmp.ne.s32.totalorder %s70_s25, %s2971_s3  ;;  %p2977_p9 = scmp.lt.s32.totalorder %s2971_s3, %s2971_s3 }
  0x50   :  { %p2978_p10 = por %p2977_p9, %p2976_p8 }
  0x52   :  { %p2979_p11 = pnand %p2978_p10, %p2972_p7 }
  0x54   :  { %2982 = shalt.err (!%p2979_p11)
}
  0x55   :  { %s3046_s2 = smov 64   ;;  %s3047_s28 = smov 4  }
  0x56   :  { %75 = dma.hbm_to_vmem [thread:$0]  %s3347_s4, 2048, %s70_s25, [#allocation9], %s3046_s2, %s3046_s2, %s3047_s28  }
  0x57   :  { %s3048_s21 = smov [#allocation11]   ;;  %s2983_s27 = scalar_lea.hbm %s3350_s7, 512 }
  0x58   :  { %s85_s23 = sshll.u32 %s3048_s21, 4  ;;  %p2984_p12 = scmp.ne.s32.totalorder %s3350_s7, %s2983_s27  ;;  %s86_s23 = int_to_ptr.vmem [resolvable:$true] %s85_s23 }
  0x59   :  { %p2987_p13 = scmp.lt.u32.totalorder %s2983_s27, %s3350_s7 }
  0x5b   :  { %p2989_p0 = pnand %p2987_p13, %p2984_p12 }
  0x5d   :  { %2992 = shalt.err (!%p2989_p0)
}
  0x5e   :  { %s2993_s11 = scalar_lea.vmem %s86_s23, 512  ;;  %p2998_p2 = scmp.lt.s32.totalorder %s86_s23, %s86_s23 }
  0x5f   :  { %p2994_p1 = scmp.ne.s32.totalorder %s86_s23, %s2993_s11  ;;  %p2999_p3 = scmp.lt.s32.totalorder %s2993_s11, %s2993_s11 }
  0x61   :  { %p3000_p4 = por %p2999_p3, %p2998_p2 }
  0x63   :  { %p3001_p5 = pnand %p3000_p4, %p2994_p1 }
  0x65   :  { %3004 = shalt.err (!%p3001_p5)
}
  0x66   :  { %s3049_s4 = smov 256   ;;  %s3050_s25 = smov 16  }
  0x67   :  { %91 = dma.hbm_to_vmem [thread:$0]  %s3350_s7, 512, %s86_s23, [#allocation12], %s3049_s4, %s3049_s4, %s3050_s25  }
  0x68   :  { %3027 = dma.done.wait [#allocation3], 64  }
  0x69   :  { %3028 = vsyncadd [#allocation3], 4294967232 }
  0x6a   :  { %3029 = dma.done.wait [#allocation6], 14592  }
  0x6b   :  { %3030 = vsyncadd [#allocation6], 4294952704 }
  0x6c   :  { %3031 = dma.done.wait [#allocation9], 14336  }
  0x6d   :  { %3032 = vsyncadd [#allocation9], 4294952960 }
  0x6e   :  { %3033 = dma.done.wait [#allocation12], 512  }
  0x6f   :  { %3034 = vsyncadd [#allocation12], 4294966784  ;;  %v3051_v0 = vmov 0   ;;  %v2534_v1 = vld [vmem:[#allocation5 + $0x4] ss:$24 sps:$4 sm:$0xff]   ;;  %vm226_vm0 = vcmask 392192   ;;  %v355_v53 = vlaneseq }
  0x70   :  { %262 = vmatprep.mubr.bf16.mxu0 %v3051_v0  ;;  %v2536_v2 = vld [vmem:[#allocation5] ss:$24 sps:$4 sm:$0xff]   ;;  %230 = vmatprep.subr.bf16.mxu0 %v2534_v1  ;;  %v2537_v3 = vld [vmem:[#allocation5 + $0x34] ss:$24 sps:$4 sm:$0xff]   ;;  %v2539_v4 = vld [vmem:[#allocation5 + $0x30] ss:$24 sps:$4 sm:$0xff]  }
  0x71   :  { %231 = vmatpush1.bf16.msra.mxu0 %v2536_v2  ;;  %v2540_v5 = vld [vmem:[#allocation5 + $0x64] ss:$24 sps:$4 sm:$0xff]   ;;  %v2542_v6 = vld [vmem:[#allocation5 + $0x60] ss:$24 sps:$4 sm:$0xff]   ;;  %v2554_v19 = vld [vmem:[#allocation5 + $0x14] ss:$24 sps:$4 sm:$0xff]  }
  0x72   :  { %232 = vmatprep.subr.bf16.mxu0 %v2537_v3  ;;  %v2545_v7 = vld [vmem:[#allocation5 + $0xc] ss:$24 sps:$4 sm:$0xff]   ;;  %v117_v8 = vld [vmem:[#allocation2] sm:$0xf]  ;;  %v2543_v9 = vld [vmem:[#allocation5 + $0x8] ss:$24 sps:$4 sm:$0xff]  }
  0x73   :  { %v2548_v10 = vld [vmem:[#allocation5 + $0x3c] ss:$24 sps:$4 sm:$0xff]   ;;  %v2563_v12 = vld [vmem:[#allocation7] ss:$8 sps:$4 sm:$0xff]   ;;  %v2564_v13 = vld [vmem:[#allocation7 + $0x14] ss:$8 sps:$4 sm:$0xff]  }
  0x74   :  { %v2561_v11 = vld [vmem:[#allocation7 + $0x4] ss:$8 sps:$4 sm:$0xff]   ;;  %v2546_v14 = vld [vmem:[#allocation5 + $0x38] ss:$24 sps:$4 sm:$0xff]   ;;  %v2551_v15 = vld [vmem:[#allocation5 + $0x6c] ss:$24 sps:$4 sm:$0xff]  }
  0x75   :  { %233 = vmatpush1.bf16.msra.mxu0 %v2539_v4  ;;  %1075 = vmatprep.subr.bf16.mxu1 %v2561_v11  ;;  %v2566_v16 = vld [vmem:[#allocation7 + $0x10] ss:$8 sps:$4 sm:$0xff]   ;;  %v2567_v17 = vld [vmem:[#allocation7 + $0x24] ss:$8 sps:$4 sm:$0xff]   ;;  %v2569_v20 = vld [vmem:[#allocation7 + $0x20] ss:$8 sps:$4 sm:$0xff]  }
  0x76   :  { %234 = vmatprep.subr.bf16.mxu0 %v2540_v5  ;;  %1076 = vmatpush1.bf16.msra.mxu1 %v2563_v12  ;;  %v2549_v18 = vld [vmem:[#allocation5 + $0x68] ss:$24 sps:$4 sm:$0xff]   ;;  %v2570_v21 = vld [vmem:[#allocation7 + $0x34] ss:$8 sps:$4 sm:$0xff]   ;;  %v2573_v25 = vld [vmem:[#allocation7 + $0x44] ss:$8 sps:$4 sm:$0xff]  }
  0x77   :  { %1077 = vmatprep.subr.bf16.mxu1 %v2564_v13  ;;  %v2552_v22 = vld [vmem:[#allocation5 + $0x10] ss:$24 sps:$4 sm:$0xff]   ;;  %v2557_v23 = vld [vmem:[#allocation5 + $0x44] ss:$24 sps:$4 sm:$0xff]   ;;  %v2555_v26 = vld [vmem:[#allocation5 + $0x40] ss:$24 sps:$4 sm:$0xff]  }
  0x78   :  { %v2572_v24 = vld [vmem:[#allocation7 + $0x30] ss:$8 sps:$4 sm:$0xff]   ;;  %v2560_v27 = vld [vmem:[#allocation5 + $0x74] ss:$24 sps:$4 sm:$0xff]   ;;  %v2575_v28 = vld [vmem:[#allocation7 + $0x40] ss:$8 sps:$4 sm:$0xff]  }
  0x79   :  { %235 = vmatpush1.bf16.msra.mxu0 %v2542_v6  ;;  %v2558_v29 = vld [vmem:[#allocation5 + $0x70] ss:$24 sps:$4 sm:$0xff]   ;;  %v2576_v30 = vld [vmem:[#allocation7 + $0x54] ss:$8 sps:$4 sm:$0xff]   ;;  %v2579_v32 = vld [vmem:[#allocation7 + $0x64] ss:$8 sps:$4 sm:$0xff]  }
  0x7a   :  { %271 = vmatprep.subr.bf16.mxu0 %v2545_v7  ;;  %1078 = vmatpush1.bf16.msra.mxu1 %v2566_v16  ;;  %v2578_v31 = vld [vmem:[#allocation7 + $0x50] ss:$8 sps:$4 sm:$0xff]   ;;  %v2581_v33 = vld [vmem:[#allocation7 + $0x60] ss:$8 sps:$4 sm:$0xff]   ;;  %v2582_v34 = vld [vmem:[#allocation7 + $0x74] ss:$8 sps:$4 sm:$0xff]  }
  0x7b   :  { %1079 = vmatprep.subr.bf16.mxu1 %v2567_v17  ;;  %v2584_v35 = vld [vmem:[#allocation7 + $0x70] ss:$8 sps:$4 sm:$0xff]   ;;  %v2585_v36 = vld [vmem:[#allocation7 + $0x84] ss:$8 sps:$4 sm:$0xff]   ;;  %v2587_v37 = vld [vmem:[#allocation7 + $0x80] ss:$8 sps:$4 sm:$0xff]  }
  0x7c   :  { %2275 = vmatmul.mubr.msk.bf16.vlgmr.msra.gmra.mrb[0].mxu0 %vm226_vm0, %v117_v8  ;;  %v2588_v38 = vld [vmem:[#allocation7 + $0x94] ss:$8 sps:$4 sm:$0xff]   ;;  %v2590_v39 = vld [vmem:[#allocation7 + $0x90] ss:$8 sps:$4 sm:$0xff]   ;;  %v2591_v40 = vld [vmem:[#allocation7 + $0xa4] ss:$8 sps:$4 sm:$0xff]  }
  0x7d   :  { %272 = vmatpush1.bf16.msra.mxu0 %v2543_v9  ;;  %303 = vmatprep.mubr.bf16.mxu0 %v3051_v0  ;;  %v2593_v41 = vld [vmem:[#allocation7 + $0xa0] ss:$8 sps:$4 sm:$0xff]   ;;  %v2594_v42 = vld [vmem:[#allocation7 + $0xb4] ss:$8 sps:$4 sm:$0xff]   ;;  %v2596_v43 = vld [vmem:[#allocation7 + $0xb0] ss:$8 sps:$4 sm:$0xff]  }
  0x7e   :  { %273 = vmatprep.subr.bf16.mxu0 %v2548_v10  ;;  %1080 = vmatpush1.bf16.msra.mxu1 %v2569_v20  ;;  %v2597_v44 = vld [vmem:[#allocation7 + $0xc4] ss:$8 sps:$4 sm:$0xff]   ;;  %v2599_v45 = vld [vmem:[#allocation7 + $0xc0] ss:$8 sps:$4 sm:$0xff]   ;;  %v2600_v46 = vld [vmem:[#allocation7 + $0xd4] ss:$8 sps:$4 sm:$0xff]  }
  0x7f   :  { %1081 = vmatprep.subr.bf16.mxu1 %v2570_v21  ;;  %v2602_v47 = vld [vmem:[#allocation7 + $0xd0] ss:$8 sps:$4 sm:$0xff]   ;;  %v2603_v48 = vld [vmem:[#allocation7 + $0xe4] ss:$8 sps:$4 sm:$0xff]   ;;  %v2605_v49 = vld [vmem:[#allocation7 + $0xe0] ss:$8 sps:$4 sm:$0xff]  }
  0x80   :  { %v2606_v50 = vld [vmem:[#allocation7 + $0xf4] ss:$8 sps:$4 sm:$0xff]   ;;  %v2608_v51 = vld [vmem:[#allocation7 + $0xf0] ss:$8 sps:$4 sm:$0xff]   ;;  %v2611_v52 = vld [vmem:[#allocation7 + $0x104] ss:$8 sps:$4 sm:$0xff]  }
  0x81   :  { %274 = vmatpush1.bf16.msra.mxu0 %v2546_v14  ;;  %v3180_v54 = vshrl.u32 %v355_v53, 7  ;;  %v3188_v56 = vld [vmem:[%s3349_s6] sm:$0xff] }
  0x82   :  { %275 = vmatprep.subr.bf16.mxu0 %v2551_v15  ;;  %1082 = vmatpush1.bf16.msra.mxu1 %v2572_v24  ;;  %v2609_v21 = vld [vmem:[#allocation7 + $0x100] ss:$8 sps:$4 sm:$0xff]  }
  0x83   :  { %1083 = vmatprep.subr.bf16.mxu1 %v2573_v25  ;;  %v3183_v55 = vsub.s32 0, %v3180_v54  ;;  %v3191_v57 = vsub.s32 2, %v3180_v54  ;;  %v3194_v58 = vsub.s32 1, %v3180_v54  ;;  %v3197_v59 = vsub.s32 3, %v3180_v54 }
  0x84   :  { %v3212_v9 = vsub.s32 6, %v3180_v54  ;;  %v3215_v13 = vsub.s32 7, %v3180_v54 }
  0x85   :  { %276 = vmatpush1.bf16.msra.mxu0 %v2549_v18  ;;  %v358_v60 = vrot.slane %v3188_v56, %v3183_v55  ;;  %v362_v61 = vrot.slane %v3188_v56, %v3191_v57  ;;  %v418_v62 = vrot.slane %v3188_v56, %v3194_v58  ;;  %v422_v63 = vrot.slane %v3188_v56, %v3197_v59 }
  0x86   :  { %312 = vmatprep.subr.bf16.mxu0 %v2554_v19  ;;  %1084 = vmatpush1.bf16.msra.mxu1 %v2575_v28  ;;  %v370_v16 = vrot.slane %v3188_v56, %v3212_v9  ;;  %v430_v19 = vrot.slane %v3188_v56, %v3215_v13  ;;  %v2707_v28 = vld [vmem:[#allocation8 + $0x4] ss:$8 sps:$4 sm:$0xff]  }
  0x87   :  { %1085 = vmatprep.subr.bf16.mxu1 %v2576_v30  ;;  %v392_v1 = vrot.slane %v362_v61, %v3183_v55  ;;  %v448_v2 = vrot.slane %v418_v62, %v3194_v58  ;;  %v452_v4 = vrot.slane %v422_v63, %v3194_v58  ;;  %v2719_v62 = vld [vmem:[#allocation8 + $0x44] ss:$8 sps:$4 sm:$0xff]   ;;  %v2621_v63 = vld [vmem:[#allocation7 + $0x140] ss:$8 sps:$4 sm:$0xff]  }
  0x88   :  { %2276 = vmatmul.mubr.msk.bf16.vlgmr.msra.gmra.mrb[4].mxu0 %vm226_vm0, %v117_v8  ;;  %v400_v24 = vrot.slane %v370_v16, %v3183_v55  ;;  %v2723_v16 = vld [vmem:[#allocation8 + $0x60] ss:$8 sps:$4 sm:$0xff]  }
  0x89   :  { %313 = vmatpush1.bf16.msra.mxu0 %v2552_v22  ;;  %344 = vmatprep.mubr.bf16.mxu0 %v3051_v0  ;;  %v388_v0 = vrot.slane %v358_v60, %v3183_v55  ;;  %v2714_v60 = vld [vmem:[#allocation8 + $0x30] ss:$8 sps:$4 sm:$0xff]  }
  0x8a   :  { %314 = vmatprep.subr.bf16.mxu0 %v2557_v23  ;;  %1086 = vmatpush1.bf16.msra.mxu1 %v2578_v31  ;;  %v2614_v23 = vld [vmem:[#allocation7 + $0x114] ss:$8 sps:$4 sm:$0xff]  }
  0x8b   :  { %1087 = vmatprep.subr.bf16.mxu1 %v2579_v32  ;;  %v2710_v31 = vld [vmem:[#allocation8 + $0x14] ss:$8 sps:$4 sm:$0xff]   ;;  %v2617_v32 = vld [vmem:[#allocation7 + $0x124] ss:$8 sps:$4 sm:$0xff]  }
  0x8d   :  { %315 = vmatpush1.bf16.msra.mxu0 %v2555_v26  ;;  %v460_v26 = vrot.slane %v430_v19, %v3194_v58  ;;  %v2635_v19 = vld [vmem:[#allocation7 + $0x184] ss:$8 sps:$4 sm:$0xff]  }
  0x8e   :  { %316 = vmatprep.subr.bf16.mxu0 %v2560_v27  ;;  %1088 = vmatpush1.bf16.msra.mxu1 %v2581_v33  ;;  %v2705_v27 = vld [vmem:[#allocation8] ss:$8 sps:$4 sm:$0xff]  }
  0x8f   :  { %1089 = vmatprep.subr.bf16.mxu1 %v2582_v34 }
  0x91   :  { %317 = vmatpush1.bf16.msra.mxu0 %v2558_v29  ;;  %v2612_v29 = vld [vmem:[#allocation7 + $0x110] ss:$8 sps:$4 sm:$0xff]  }
  0x92   :  { %1090 = vmatpush1.bf16.msra.mxu1 %v2584_v35  ;;  %v3228_v35 = vld [vmem:[%s3349_s6 + $0x8] sm:$0xf]  ;;  %1426 = vmatprep.subr.bf16.mxu0 %v2707_v28 }
  0x93   :  { %1091 = vmatprep.subr.bf16.mxu1 %v2585_v36  ;;  %v2641_v28 = vld [vmem:[#allocation7 + $0x1a4] ss:$8 sps:$4 sm:$0xff]  }
  0x94   :  { %2277 = vmatmul.mubr.msk.bf16.vlgmr.msra.gmra.mrb[8].mxu0 %vm226_vm0, %v117_v8 }
  0x95   :  { %1427 = vmatpush1.bf16.msra.mxu0 %v2705_v27  ;;  %v2636_v27 = vld [vmem:[#allocation7 + $0x190] ss:$8 sps:$4 sm:$0xff]  }
  0x96   :  { %1092 = vmatpush1.bf16.msra.mxu1 %v2587_v37  ;;  %v2708_v37 = vld [vmem:[#allocation8 + $0x10] ss:$8 sps:$4 sm:$0xff]   ;;  %1428 = vmatprep.subr.bf16.mxu0 %v2710_v31  ;;  %v2737_v31 = vld [vmem:[#allocation8 + $0xa4] ss:$8 sps:$4 sm:$0xff]  }
  0x97   :  { %1093 = vmatprep.subr.bf16.mxu1 %v2588_v38 }
  0x99   :  { %1429 = vmatpush1.bf16.msra.mxu0 %v2708_v37  ;;  %v3248_v37 = vsub.s32 5, %v3180_v54 }
  0x9a   :  { %1094 = vmatpush1.bf16.msra.mxu1 %v2590_v39  ;;  %v2713_v39 = vld [vmem:[#allocation8 + $0x24] ss:$8 sps:$4 sm:$0xff]  }
  0x9b   :  { %1095 = vmatprep.subr.bf16.mxu1 %v2591_v40  ;;  %v2615_v40 = vld [vmem:[#allocation7 + $0x120] ss:$8 sps:$4 sm:$0xff]   ;;  %1430 = vmatprep.subr.bf16.mxu0 %v2713_v39  ;;  %v2740_v39 = vld [vmem:[#allocation8 + $0xb4] ss:$8 sps:$4 sm:$0xff]  }
  0x9e   :  { %1096 = vmatpush1.bf16.msra.mxu1 %v2593_v41  ;;  %v374_v41 = vrot.slane %v3228_v35, %v3183_v55 }
  0x9f   :  { %1097 = vmatprep.subr.bf16.mxu1 %v2594_v42  ;;  %v2620_v42 = vld [vmem:[#allocation7 + $0x134] ss:$8 sps:$4 sm:$0xff]  }
  0xa2   :  { %1098 = vmatpush1.bf16.msra.mxu1 %v2596_v43 }
  0xa3   :  { %1099 = vmatprep.subr.bf16.mxu1 %v2597_v44  ;;  %v434_v44 = vrot.slane %v3228_v35, %v3194_v58 }
  0xa6   :  { %1100 = vmatpush1.bf16.msra.mxu1 %v2599_v45  ;;  %v2711_v45 = vld [vmem:[#allocation8 + $0x20] ss:$8 sps:$4 sm:$0xff]  }
  0xa7   :  { %1101 = vmatprep.subr.bf16.mxu1 %v2600_v46  ;;  %1431 = vmatpush1.bf16.msra.mxu0 %v2711_v45  ;;  %v426_v45 = vrot.slane %v3188_v56, %v3248_v37 }
  0xaa   :  { %1102 = vmatpush1.bf16.msra.mxu1 %v2602_v47  ;;  %v2716_v47 = vld [vmem:[#allocation8 + $0x34] ss:$8 sps:$4 sm:$0xff]  }
  0xab   :  { %1103 = vmatprep.subr.bf16.mxu1 %v2603_v48  ;;  %v2618_v48 = vld [vmem:[#allocation7 + $0x130] ss:$8 sps:$4 sm:$0xff]   ;;  %1432 = vmatprep.subr.bf16.mxu0 %v2716_v47  ;;  %v2645_v47 = vld [vmem:[#allocation7 + $0x1c0] ss:$8 sps:$4 sm:$0xff]  }
  0xac   :  { %1433 = vmatpush1.bf16.msra.mxu0 %v2714_v60  ;;  %v2653_v60 = vld [vmem:[#allocation7 + $0x1e4] ss:$8 sps:$4 sm:$0xff]  }
  0xad   :  { %1434 = vmatprep.subr.bf16.mxu0 %v2719_v62 }
  0xae   :  { %1104 = vmatpush1.bf16.msra.mxu1 %v2605_v49 }
  0xaf   :  { %1105 = vmatprep.subr.bf16.mxu1 %v2606_v50  ;;  %v404_v50 = vrot.slane %v374_v41, %v3183_v55  ;;  %v2647_v41 = vld [vmem:[#allocation7 + $0x1c4] ss:$8 sps:$4 sm:$0xff]  }
  0xb2   :  { %1106 = vmatpush1.bf16.msra.mxu1 %v2608_v51  ;;  %v2623_v51 = vld [vmem:[#allocation7 + $0x144] ss:$8 sps:$4 sm:$0xff]  }
  0xb3   :  { %1116 = vmatprep.subr.bf16.mxu1 %v2611_v52  ;;  %v464_v52 = vrot.slane %v434_v44, %v3194_v58 }
 0x14f   :  { %v264_v3 = vpop.f32.mrb[0].mxu0 }
 0x150   :  { %v409_v5 = vmul.f32 %v388_v0, %v264_v3  ;;  %v266_v6 = vpop.f32.mrb[1].mxu0 }
 0x151   :  { %v410_v7 = vmul.f32 %v392_v1, %v266_v6  ;;  %v268_v8 = vpop.f32.mrb[2].mxu0  ;;  %v2717_v6 = vld [vmem:[#allocation8 + $0x40] ss:$8 sps:$4 sm:$0xff]  }
 0x152   :  { %v469_v10 = vadd.f32 %v448_v2, %v409_v5  ;;  %v269_v11 = vpop.f32.mrb[3].mxu0  ;;  %v2626_v2 = vld [vmem:[#allocation7 + $0x154] ss:$8 sps:$4 sm:$0xff]   ;;  %v2624_v8 = vld [vmem:[#allocation7 + $0x150] ss:$8 sps:$4 sm:$0xff]   ;;  %1435 = vmatpush1.bf16.msra.mxu0 %v2717_v6 }
 0x153   :  { %v470_v12 = vadd.f32 %v452_v4, %v410_v7  ;;  %v2722_v7 = vld [vmem:[#allocation8 + $0x54] ss:$8 sps:$4 sm:$0xff]   ;;  %v2720_v11 = vld [vmem:[#allocation8 + $0x50] ss:$8 sps:$4 sm:$0xff]  }
 0x154   :  { %v481_v14 = vmul.f32 0.1, %v469_v10  ;;  %vm475_vm1 = vcmp.ge.f32.partialorder %v469_v10, 0.0  ;;  %1436 = vmatprep.subr.bf16.mxu0 %v2722_v7  ;;  %v2657_v7 = vld [vmem:[#allocation7 + $0x200] ss:$8 sps:$4 sm:$0xff]  }
 0x155   :  { %vm476_vm2 = vcmp.ge.f32.partialorder %v470_v12, 0.0  ;;  %v482_v15 = vmul.f32 0.1, %v470_v12 }
 0x156   :  { %v487_v17 = vsel %vm475_vm1, %v469_v10, %v481_v14  ;;  %v2629_v10 = vld [vmem:[#allocation7 + $0x164] ss:$8 sps:$4 sm:$0xff]   ;;  %v2627_v14 = vld [vmem:[#allocation7 + $0x160] ss:$8 sps:$4 sm:$0xff]   ;;  %1437 = vmatpush1.bf16.msra.mxu0 %v2720_v11  ;;  %v2662_v11 = vld [vmem:[#allocation7 + $0x214] ss:$8 sps:$4 sm:$0xff]  }
 0x157   :  { %v488_v18 = vsel %vm476_vm2, %v470_v12, %v482_v15  ;;  %v493_v22 = vpack.c.bf16 %v487_v17, %v487_v17  ;;  %v2725_v12 = vld [vmem:[#allocation8 + $0x64] ss:$8 sps:$4 sm:$0xff]   ;;  %v2632_v15 = vld [vmem:[#allocation7 + $0x174] ss:$8 sps:$4 sm:$0xff]  }
 0x158   :  { %v494_v20 = vpack.c.bf16 %v488_v18, %v488_v18  ;;  %1438 = vmatprep.subr.bf16.mxu0 %v2725_v12  ;;  %v2728_v17 = vld [vmem:[#allocation8 + $0x74] ss:$8 sps:$4 sm:$0xff]   ;;  %v2630_v18 = vld [vmem:[#allocation7 + $0x170] ss:$8 sps:$4 sm:$0xff]  }
 0x159   :  { %v2660_v12 = vld [vmem:[#allocation7 + $0x210] ss:$8 sps:$4 sm:$0xff]  }
 0x15a   :  { %1107 = vmatprep.mubr.bf16.mxu1 %v494_v20  ;;  %1439 = vmatpush1.bf16.msra.mxu0 %v2723_v16  ;;  %v2726_v20 = vld [vmem:[#allocation8 + $0x70] ss:$8 sps:$4 sm:$0xff]   ;;  %v2668_v16 = vld [vmem:[#allocation7 + $0x234] ss:$8 sps:$4 sm:$0xff]  }
 0x15b   :  { %1108 = vmatmul.mubr.bf16.vlgmr.msra.gmra.mrb[0].mxu1 %v493_v22  ;;  %v3222_v25 = vpop.f32.mrb[4].mxu0  ;;  %1440 = vmatprep.subr.bf16.mxu0 %v2728_v17  ;;  %v2633_v22 = vld [vmem:[#allocation7 + $0x180] ss:$8 sps:$4 sm:$0xff]   ;;  %v2666_v17 = vld [vmem:[#allocation7 + $0x230] ss:$8 sps:$4 sm:$0xff]  }
 0x15c   :  { %1117 = vmatpush1.bf16.msra.mxu1 %v2609_v21  ;;  %v307_v30 = vpop.f32.mrb[5].mxu0  ;;  %v2731_v21 = vld [vmem:[#allocation8 + $0x84] ss:$8 sps:$4 sm:$0xff]  }
 0x15d   :  { %1118 = vmatprep.subr.bf16.mxu1 %v2614_v23  ;;  %v412_v33 = vmul.f32 %v400_v24, %v307_v30  ;;  %v309_v34 = vpop.f32.mrb[6].mxu0  ;;  %v2638_v23 = vld [vmem:[#allocation7 + $0x194] ss:$8 sps:$4 sm:$0xff]   ;;  %v2729_v24 = vld [vmem:[#allocation8 + $0x80] ss:$8 sps:$4 sm:$0xff]  }
 0x15e   :  { %v310_v36 = vpop.f32.mrb[7].mxu0  ;;  %1441 = vmatpush1.bf16.msra.mxu0 %v2726_v20  ;;  %v2732_v30 = vld [vmem:[#allocation8 + $0x90] ss:$8 sps:$4 sm:$0xff]   ;;  %v378_v34 = vrot.slane %v3228_v35, %v3191_v57  ;;  %v2674_v20 = vld [vmem:[#allocation7 + $0x254] ss:$8 sps:$4 sm:$0xff]  }
 0x15f   :  { %v472_v38 = vadd.f32 %v460_v26, %v412_v33  ;;  %1442 = vmatprep.subr.bf16.mxu0 %v2731_v21  ;;  %v2734_v26 = vld [vmem:[#allocation8 + $0x94] ss:$8 sps:$4 sm:$0xff]   ;;  %v2672_v21 = vld [vmem:[#allocation7 + $0x250] ss:$8 sps:$4 sm:$0xff]  }
 0x160   :  { %1119 = vmatpush1.bf16.msra.mxu1 %v2612_v29  ;;  %v3241_v29 = vsub.s32 4, %v3180_v54  ;;  %v2644_v33 = vld [vmem:[#allocation7 + $0x1b4] ss:$8 sps:$4 sm:$0xff]   ;;  %v2738_v54 = vld [vmem:[#allocation8 + $0xb0] ss:$8 sps:$4 sm:$0xff]  }
 0x161   :  { %1120 = vmatprep.subr.bf16.mxu1 %v2617_v32  ;;  %v484_v43 = vmul.f32 0.1, %v472_v38  ;;  %vm478_vm3 = vcmp.ge.f32.partialorder %v472_v38, 0.0  ;;  %v2639_v32 = vld [vmem:[#allocation7 + $0x1a0] ss:$8 sps:$4 sm:$0xff]  }
 0x162   :  { %1443 = vmatpush1.bf16.msra.mxu0 %v2729_v24  ;;  %v366_v36 = vrot.slane %v3188_v56, %v3241_v29  ;;  %v2648_v56 = vld [vmem:[#allocation7 + $0x1d0] ss:$8 sps:$4 sm:$0xff]   ;;  %v2680_v24 = vld [vmem:[#allocation7 + $0x274] ss:$8 sps:$4 sm:$0xff]  }
 0x163   :  { %v490_v46 = vsel %vm478_vm3, %v472_v38, %v484_v43  ;;  %1444 = vmatprep.subr.bf16.mxu0 %v2734_v26  ;;  %v2735_v38 = vld [vmem:[#allocation8 + $0xa0] ss:$8 sps:$4 sm:$0xff]   ;;  %v438_v43 = vrot.slane %v3228_v35, %v3197_v59  ;;  %v456_v35 = vrot.slane %v426_v45, %v3194_v58  ;;  %v2678_v26 = vld [vmem:[#allocation7 + $0x270] ss:$8 sps:$4 sm:$0xff]  }
 0x164   :  { %1121 = vmatpush1.bf16.msra.mxu1 %v2615_v40  ;;  %v496_v49 = vpack.c.bf16 %v490_v46, %v490_v46  ;;  %v2642_v40 = vld [vmem:[#allocation7 + $0x1b0] ss:$8 sps:$4 sm:$0xff]   ;;  %v396_v44 = vrot.slane %v366_v36, %v3183_v55  ;;  %v2743_v46 = vld [vmem:[#allocation8 + $0xc4] ss:$8 sps:$4 sm:$0xff]  }
 0x165   :  { %1122 = vmatprep.subr.bf16.mxu1 %v2620_v42  ;;  %v408_v42 = vrot.slane %v378_v34, %v3183_v55  ;;  %v2692_v34 = vld [vmem:[#allocation7 + $0x2b4] ss:$8 sps:$4 sm:$0xff]   ;;  %v2690_v36 = vld [vmem:[#allocation7 + $0x2b0] ss:$8 sps:$4 sm:$0xff]  }
 0x166   :  { %1148 = vmatprep.mubr.bf16.mxu1 %v496_v49  ;;  %1445 = vmatpush1.bf16.msra.mxu0 %v2732_v30  ;;  %v2686_v30 = vld [vmem:[#allocation7 + $0x294] ss:$8 sps:$4 sm:$0xff]  }
 0x167   :  { %v346_v61 = vpop.f32.mrb[8].mxu0  ;;  %1446 = vmatprep.subr.bf16.mxu0 %v2737_v31  ;;  %v2684_v31 = vld [vmem:[#allocation7 + $0x290] ss:$8 sps:$4 sm:$0xff]  }
 0x168   :  { %1123 = vmatpush1.bf16.msra.mxu1 %v2618_v48  ;;  %v413_v0 = vmul.f32 %v404_v50, %v346_v61  ;;  %v3236_v1 = vpop.f32.mrb[9].mxu0  ;;  %v2650_v48 = vld [vmem:[#allocation7 + $0x1d4] ss:$8 sps:$4 sm:$0xff]   ;;  %v468_v50 = vrot.slane %v438_v43, %v3194_v58  ;;  %v2699_v43 = vld [vmem:[#allocation7 + $0x2e0] ss:$8 sps:$4 sm:$0xff]  }
 0x169   :  { %1124 = vmatprep.subr.bf16.mxu1 %v2623_v51  ;;  %v350_v3 = vpop.f32.mrb[10].mxu0  ;;  %v414_v49 = vmul.f32 %v408_v42, %v3236_v1  ;;  %v411_v51 = vmul.f32 %v396_v44, %v3222_v25  ;;  %v2654_v25 = vld [vmem:[#allocation7 + $0x1f0] ss:$8 sps:$4 sm:$0xff]   ;;  %v2701_v42 = vld [vmem:[#allocation7 + $0x2e4] ss:$8 sps:$4 sm:$0xff]  }
 0x16a   :  { %v3238_v4 = vadd.f32 %v464_v52, %v413_v0  ;;  %v351_v5 = vpop.f32.mrb[11].mxu0  ;;  %1447 = vmatpush1.bf16.msra.mxu0 %v2735_v38  ;;  %v2741_v52 = vld [vmem:[#allocation8 + $0xc0] ss:$8 sps:$4 sm:$0xff]   ;;  %v2656_v0 = vld [vmem:[#allocation7 + $0x1f4] ss:$8 sps:$4 sm:$0xff]  }
 0x16b   :  { %1448 = vmatprep.subr.bf16.mxu0 %v2740_v39  ;;  %v474_v61 = vadd.f32 %v468_v50, %v414_v49  ;;  %v471_v62 = vadd.f32 %v456_v35, %v411_v51  ;;  %v2659_v3 = vld [vmem:[#allocation7 + $0x204] ss:$8 sps:$4 sm:$0xff]   ;;  %v2693_v39 = vld [vmem:[#allocation7 + $0x2c0] ss:$8 sps:$4 sm:$0xff]   ;;  %v2704_v44 = vld [vmem:[#allocation7 + $0x2f4] ss:$8 sps:$4 sm:$0xff]  }
 0x16c   :  { %1125 = vmatpush1.bf16.msra.mxu1 %v2621_v63  ;;  %v2651_v63 = vld [vmem:[#allocation7 + $0x1e0] ss:$8 sps:$4 sm:$0xff]   ;;  %v2695_v38 = vld [vmem:[#allocation7 + $0x2c4] ss:$8 sps:$4 sm:$0xff]   ;;  %v485_v45 = vmul.f32 0.1, %v3238_v4 }
 0x16d   :  { %1126 = vmatprep.subr.bf16.mxu1 %v2626_v2  ;;  %v486_v1 = vmul.f32 0.1, %v474_v61  ;;  %v483_v2 = vmul.f32 0.1, %v471_v62  ;;  %vm480_vm4 = vcmp.ge.f32.partialorder %v474_v61, 0.0  ;;  %vm477_vm5 = vcmp.ge.f32.partialorder %v471_v62, 0.0 }
 0x16e   :  { %1449 = vmatpush1.bf16.msra.mxu0 %v2738_v54  ;;  %vm479_vm6 = vcmp.ge.f32.partialorder %v3238_v4, 0.0  ;;  %v2702_v54 = vld [vmem:[#allocation7 + $0x2f0] ss:$8 sps:$4 sm:$0xff]   ;;  %v2749_v50 = vld [vmem:[#allocation8 + $0xe4] ss:$8 sps:$4 sm:$0xff]  }
 0x16f   :  { %1450 = vmatprep.subr.bf16.mxu0 %v2743_v46  ;;  %v492_v5 = vsel %vm480_vm4, %v474_v61, %v486_v1  ;;  %v489_v6 = vsel %vm477_vm5, %v471_v62, %v483_v2  ;;  %v491_v46 = vsel %vm479_vm6, %v3238_v4, %v485_v45  ;;  %v2744_v49 = vld [vmem:[#allocation8 + $0xd0] ss:$8 sps:$4 sm:$0xff]   ;;  %v2747_v51 = vld [vmem:[#allocation8 + $0xe0] ss:$8 sps:$4 sm:$0xff]   ;;  %v2752_v35 = vld [vmem:[#allocation8 + $0xf4] ss:$8 sps:$4 sm:$0xff]  }
 0x170   :  { %1127 = vmatpush1.bf16.msra.mxu1 %v2624_v8  ;;  %v498_v8 = vpack.c.bf16 %v492_v5, %v492_v5  ;;  %v3265_v4 = vld [vmem:[#allocation11 + $0x8] sm:$0xff] }
 0x171   :  { %1128 = vmatprep.subr.bf16.mxu1 %v2629_v10  ;;  %v495_v10 = vpack.c.bf16 %v489_v6, %v489_v6  ;;  %v1205_v62 = vrot.slane %v3265_v4, %v3183_v55  ;;  %v1215_v1 = vrot.slane %v3265_v4, %v3194_v58  ;;  %v2789_v45 = vld [vmem:[#allocation8 + $0x1c0] ss:$8 sps:$4 sm:$0xff]  }
 0x172   :  { %1451 = vmatpush1.bf16.msra.mxu0 %v2741_v52  ;;  %v2750_v52 = vld [vmem:[#allocation8 + $0xf0] ss:$8 sps:$4 sm:$0xff]  }
 0x174   :  { %1129 = vmatpush1.bf16.msra.mxu1 %v2627_v14  ;;  %v2665_v14 = vld [vmem:[#allocation7 + $0x224] ss:$8 sps:$4 sm:$0xff]  }
 0x175   :  { %1130 = vmatprep.subr.bf16.mxu1 %v2632_v15  ;;  %v2663_v15 = vld [vmem:[#allocation7 + $0x220] ss:$8 sps:$4 sm:$0xff]  }
 0x178   :  { %1131 = vmatpush1.bf16.msra.mxu1 %v2630_v18  ;;  %v2671_v18 = vld [vmem:[#allocation7 + $0x244] ss:$8 sps:$4 sm:$0xff]  }
 0x179   :  { %1132 = vmatprep.subr.bf16.mxu1 %v2635_v19  ;;  %v2669_v19 = vld [vmem:[#allocation7 + $0x240] ss:$8 sps:$4 sm:$0xff]  }
 0x17c   :  { %1133 = vmatpush1.bf16.msra.mxu1 %v2633_v22  ;;  %v2677_v22 = vld [vmem:[#allocation7 + $0x264] ss:$8 sps:$4 sm:$0xff]  }
 0x17d   :  { %1134 = vmatprep.subr.bf16.mxu1 %v2638_v23  ;;  %v2675_v23 = vld [vmem:[#allocation7 + $0x260] ss:$8 sps:$4 sm:$0xff]  }
 0x180   :  { %1135 = vmatpush1.bf16.msra.mxu1 %v2636_v27  ;;  %v2683_v27 = vld [vmem:[#allocation7 + $0x284] ss:$8 sps:$4 sm:$0xff]  }
 0x181   :  { %1136 = vmatprep.subr.bf16.mxu1 %v2641_v28  ;;  %v2681_v28 = vld [vmem:[#allocation7 + $0x280] ss:$8 sps:$4 sm:$0xff]  }
 0x184   :  { %1137 = vmatpush1.bf16.msra.mxu1 %v2639_v32  ;;  %v2689_v32 = vld [vmem:[#allocation7 + $0x2a4] ss:$8 sps:$4 sm:$0xff]  }
 0x185   :  { %1138 = vmatprep.subr.bf16.mxu1 %v2644_v33  ;;  %v2687_v33 = vld [vmem:[#allocation7 + $0x2a0] ss:$8 sps:$4 sm:$0xff]  }
 0x188   :  { %1139 = vmatpush1.bf16.msra.mxu1 %v2642_v40  ;;  %v2698_v40 = vld [vmem:[#allocation7 + $0x2d4] ss:$8 sps:$4 sm:$0xff]  }
 0x189   :  { %1140 = vmatprep.subr.bf16.mxu1 %v2647_v41  ;;  %v2696_v41 = vld [vmem:[#allocation7 + $0x2d0] ss:$8 sps:$4 sm:$0xff]  }
 0x18c   :  { %1141 = vmatpush1.bf16.msra.mxu1 %v2645_v47  ;;  %v497_v47 = vpack.c.bf16 %v491_v46, %v491_v46  ;;  %v2792_v46 = vld [vmem:[#allocation8 + $0x1d0] ss:$8 sps:$4 sm:$0xff]  }
 0x18d   :  { %1142 = vmatprep.subr.bf16.mxu1 %v2650_v48  ;;  %v2746_v48 = vld [vmem:[#allocation8 + $0xd4] ss:$8 sps:$4 sm:$0xff]  }
 0x18e   :  { %1452 = vmatprep.subr.bf16.mxu0 %v2746_v48  ;;  %v2795_v48 = vld [vmem:[#allocation8 + $0x1e0] ss:$8 sps:$4 sm:$0xff]  }
 0x18f   :  { %1453 = vmatpush1.bf16.msra.mxu0 %v2744_v49  ;;  %v2798_v49 = vld [vmem:[#allocation8 + $0x1f0] ss:$8 sps:$4 sm:$0xff]  }
 0x190   :  { %1143 = vmatpush1.bf16.msra.mxu1 %v2648_v56  ;;  %1454 = vmatprep.subr.bf16.mxu0 %v2749_v50  ;;  %v2755_v56 = vld [vmem:[#allocation8 + $0x104] ss:$8 sps:$4 sm:$0xff]   ;;  %v2800_v50 = vld [vmem:[#allocation8 + $0x1f4] ss:$8 sps:$4 sm:$0xff]  }
 0x191   :  { %1144 = vmatprep.subr.bf16.mxu1 %v2653_v60  ;;  %v3263_v60 = vld [vmem:[#allocation11] sm:$0xff] }
 0x192   :  { %v1201_v61 = vrot.slane %v3263_v60, %v3183_v55 }
 0x193   :  { %1455 = vmatpush1.bf16.msra.mxu0 %v2747_v51  ;;  %v2803_v51 = vld [vmem:[#allocation8 + $0x204] ss:$8 sps:$4 sm:$0xff]  }
 0x194   :  { %1145 = vmatpush1.bf16.msra.mxu1 %v2651_v63  ;;  %1456 = vmatprep.subr.bf16.mxu0 %v2752_v35  ;;  %v1211_v63 = vrot.slane %v3263_v60, %v3194_v58  ;;  %v1261_v35 = vrot.slane %v3263_v60, %v3191_v57 }
 0x195   :  { %1146 = vmatprep.subr.bf16.mxu1 %v2656_v0 }
 0x197   :  { %1457 = vmatpush1.bf16.msra.mxu0 %v2750_v52  ;;  %v1265_v52 = vrot.slane %v3265_v4, %v3191_v57 }
 0x198   :  { %1147 = vmatpush1.bf16.msra.mxu1 %v2654_v25  ;;  %1698 = vmatprep.subr.bf16.mxu0 %v2755_v56 }
 0x199   :  { %1157 = vmatprep.subr.bf16.mxu1 %v2659_v3 }
 0x19b   :  { %1149 = vmatmul.mubr.bf16.vlgmr.msra.gmra.mrb[0].mxu1 %v495_v10 }
 0x19c   :  { %1158 = vmatpush1.bf16.msra.mxu1 %v2657_v7  ;;  %1189 = vmatprep.mubr.bf16.mxu1 %v498_v8 }
 0x19d   :  { %1159 = vmatprep.subr.bf16.mxu1 %v2662_v11 }
 0x1a0   :  { %1160 = vmatpush1.bf16.msra.mxu1 %v2660_v12 }
 0x1a1   :  { %1161 = vmatprep.subr.bf16.mxu1 %v2665_v14 }
 0x1a4   :  { %1162 = vmatpush1.bf16.msra.mxu1 %v2663_v15 }
 0x1a5   :  { %1163 = vmatprep.subr.bf16.mxu1 %v2668_v16  ;;  %v2753_v16 = vld [vmem:[#allocation8 + $0x100] ss:$8 sps:$4 sm:$0xff]  }
 0x1a8   :  { %1164 = vmatpush1.bf16.msra.mxu1 %v2666_v17 }
 0x1a9   :  { %1165 = vmatprep.subr.bf16.mxu1 %v2671_v18  ;;  %v2758_v18 = vld [vmem:[#allocation8 + $0x114] ss:$8 sps:$4 sm:$0xff]  }
 0x1ac   :  { %1166 = vmatpush1.bf16.msra.mxu1 %v2669_v19  ;;  %v2756_v19 = vld [vmem:[#allocation8 + $0x110] ss:$8 sps:$4 sm:$0xff]  }
 0x1ad   :  { %1167 = vmatprep.subr.bf16.mxu1 %v2674_v20  ;;  %v2761_v20 = vld [vmem:[#allocation8 + $0x124] ss:$8 sps:$4 sm:$0xff]  }
 0x1b0   :  { %1168 = vmatpush1.bf16.msra.mxu1 %v2672_v21  ;;  %v2759_v21 = vld [vmem:[#allocation8 + $0x120] ss:$8 sps:$4 sm:$0xff]  }
 0x1b1   :  { %1169 = vmatprep.subr.bf16.mxu1 %v2677_v22  ;;  %v2764_v22 = vld [vmem:[#allocation8 + $0x134] ss:$8 sps:$4 sm:$0xff]  }
 0x1b4   :  { %1170 = vmatpush1.bf16.msra.mxu1 %v2675_v23  ;;  %v2762_v23 = vld [vmem:[#allocation8 + $0x130] ss:$8 sps:$4 sm:$0xff]  }
 0x1b5   :  { %1171 = vmatprep.subr.bf16.mxu1 %v2680_v24  ;;  %v2767_v24 = vld [vmem:[#allocation8 + $0x144] ss:$8 sps:$4 sm:$0xff]  }
 0x1b8   :  { %1172 = vmatpush1.bf16.msra.mxu1 %v2678_v26  ;;  %v2765_v26 = vld [vmem:[#allocation8 + $0x140] ss:$8 sps:$4 sm:$0xff]  }
 0x1b9   :  { %1173 = vmatprep.subr.bf16.mxu1 %v2683_v27  ;;  %v2770_v27 = vld [vmem:[#allocation8 + $0x154] ss:$8 sps:$4 sm:$0xff]  }
 0x1bc   :  { %1174 = vmatpush1.bf16.msra.mxu1 %v2681_v28  ;;  %v2768_v28 = vld [vmem:[#allocation8 + $0x150] ss:$8 sps:$4 sm:$0xff]  }
 0x1bd   :  { %1175 = vmatprep.subr.bf16.mxu1 %v2686_v30  ;;  %v2773_v30 = vld [vmem:[#allocation8 + $0x164] ss:$8 sps:$4 sm:$0xff]  }
 0x1c0   :  { %1176 = vmatpush1.bf16.msra.mxu1 %v2684_v31  ;;  %v2771_v31 = vld [vmem:[#allocation8 + $0x160] ss:$8 sps:$4 sm:$0xff]  }
 0x1c1   :  { %1177 = vmatprep.subr.bf16.mxu1 %v2689_v32  ;;  %v2776_v32 = vld [vmem:[#allocation8 + $0x174] ss:$8 sps:$4 sm:$0xff]  }
 0x1c4   :  { %1178 = vmatpush1.bf16.msra.mxu1 %v2687_v33  ;;  %v2774_v33 = vld [vmem:[#allocation8 + $0x170] ss:$8 sps:$4 sm:$0xff]  }
 0x1c5   :  { %1179 = vmatprep.subr.bf16.mxu1 %v2692_v34  ;;  %v2779_v34 = vld [vmem:[#allocation8 + $0x184] ss:$8 sps:$4 sm:$0xff]  }
 0x1c8   :  { %1180 = vmatpush1.bf16.msra.mxu1 %v2690_v36  ;;  %v2777_v36 = vld [vmem:[#allocation8 + $0x180] ss:$8 sps:$4 sm:$0xff]  }
 0x1c9   :  { %1181 = vmatprep.subr.bf16.mxu1 %v2695_v38  ;;  %v2782_v38 = vld [vmem:[#allocation8 + $0x194] ss:$8 sps:$4 sm:$0xff]  }
 0x1cc   :  { %1182 = vmatpush1.bf16.msra.mxu1 %v2693_v39  ;;  %v2780_v39 = vld [vmem:[#allocation8 + $0x190] ss:$8 sps:$4 sm:$0xff]  }
 0x1cd   :  { %1183 = vmatprep.subr.bf16.mxu1 %v2698_v40  ;;  %v2785_v40 = vld [vmem:[#allocation8 + $0x1a4] ss:$8 sps:$4 sm:$0xff]  }
 0x1d0   :  { %1184 = vmatpush1.bf16.msra.mxu1 %v2696_v41  ;;  %v2783_v41 = vld [vmem:[#allocation8 + $0x1a0] ss:$8 sps:$4 sm:$0xff]  }
 0x1d1   :  { %1185 = vmatprep.subr.bf16.mxu1 %v2701_v42  ;;  %v2788_v42 = vld [vmem:[#allocation8 + $0x1b4] ss:$8 sps:$4 sm:$0xff]  }
 0x1d4   :  { %1186 = vmatpush1.bf16.msra.mxu1 %v2699_v43  ;;  %v2786_v43 = vld [vmem:[#allocation8 + $0x1b0] ss:$8 sps:$4 sm:$0xff]  }
 0x1d5   :  { %1187 = vmatprep.subr.bf16.mxu1 %v2704_v44  ;;  %v2791_v44 = vld [vmem:[#allocation8 + $0x1c4] ss:$8 sps:$4 sm:$0xff]  }
 0x1d8   :  { %1188 = vmatpush1.bf16.msra.mxu1 %v2702_v54  ;;  %v2794_v54 = vld [vmem:[#allocation8 + $0x1d4] ss:$8 sps:$4 sm:$0xff]  }
 0x1db   :  { %1190 = vmatmul.mubr.bf16.vlgmr.msra.gmra.mrb[0].mxu1 %v497_v47  ;;  %v2797_v47 = vld [vmem:[#allocation8 + $0x1e4] ss:$8 sps:$4 sm:$0xff]  }
 0x2ae   :  { %v1191_v0 = vpop.f32.mrb[0].mxu1 }
 0x2af   :  { %v1206_v2 = vmul.f32 %v1201_v61, %v1191_v0  ;;  %v1193_v25 = vpop.f32.mrb[1].mxu1 }
 0x2b0   :  { %v1207_v3 = vmul.f32 %v1205_v62, %v1193_v25  ;;  %v1195_v5 = vpop.f32.mrb[2].mxu1  ;;  %v1472_v62 = vrot.slane %v3263_v60, %v3197_v59 }
 0x2b1   :  { %v1216_v6 = vadd.f32 %v1211_v63, %v1206_v2  ;;  %v1196_v7 = vpop.f32.mrb[3].mxu1 }
 0x2b2   :  { %v1217_v8 = vadd.f32 %v1215_v1, %v1207_v3  ;;  %v1476_v1 = vrot.slane %v3265_v4, %v3197_v59  ;;  %v1482_v3 = vrot.slane %v3263_v60, %v3241_v29  ;;  %v1486_v7 = vrot.slane %v3265_v4, %v3241_v29  ;;  %v2806_v29 = vld [vmem:[#allocation8 + $0x214] ss:$8 sps:$4 sm:$0xff]  }
 0x2b3   :  { %vm1218_vm7 = vcmp.ge.f32.partialorder %v1216_v6, 0.0  ;;  %v1220_v10 = vmul.f32 0.1, %v1216_v6 }
 0x2b4   :  { %vm1219_vm8 = vcmp.ge.f32.partialorder %v1217_v8, 0.0  ;;  %v1221_v11 = vmul.f32 0.1, %v1217_v8 }
 0x2b5   :  { %v3275_v12 = vsel %vm1218_vm7, %v1216_v6, %v1220_v10 }
 0x2b6   :  { %v3277_v14 = vsel %vm1219_vm8, %v1217_v8, %v1221_v11  ;;  %v1224_v17 = vpack.c.bf16 %v3275_v12, %v3275_v12 }
 0x2b7   :  { %v1225_v15 = vpack.c.bf16 %v3277_v14, %v3277_v14 }
 0x2b9   :  { %1458 = vmatprep.mubr.bf16.mxu0 %v1225_v15 }
 0x2ba   :  { %1459 = vmatmul.mubr.bf16.vlgmr.msra.gmra.mrb[12].mxu0 %v1224_v17 }
 0x2bb   :  { %1699 = vmatpush1.bf16.msra.mxu0 %v2753_v16 }
 0x2bc   :  { %1700 = vmatprep.subr.bf16.mxu0 %v2758_v18 }
 0x2bf   :  { %1701 = vmatpush1.bf16.msra.mxu0 %v2756_v19  ;;  %v2801_v19 = vld [vmem:[#allocation8 + $0x200] ss:$8 sps:$4 sm:$0xff]  }
 0x2c0   :  { %1702 = vmatprep.subr.bf16.mxu0 %v2761_v20  ;;  %v2804_v20 = vld [vmem:[#allocation8 + $0x210] ss:$8 sps:$4 sm:$0xff]  }
 0x2c3   :  { %1703 = vmatpush1.bf16.msra.mxu0 %v2759_v21  ;;  %v2809_v21 = vld [vmem:[#allocation8 + $0x224] ss:$8 sps:$4 sm:$0xff]  }
 0x2c4   :  { %1704 = vmatprep.subr.bf16.mxu0 %v2764_v22  ;;  %v2807_v22 = vld [vmem:[#allocation8 + $0x220] ss:$8 sps:$4 sm:$0xff]  }
 0x2c7   :  { %1705 = vmatpush1.bf16.msra.mxu0 %v2762_v23  ;;  %v2812_v23 = vld [vmem:[#allocation8 + $0x234] ss:$8 sps:$4 sm:$0xff]  }
 0x2c8   :  { %1706 = vmatprep.subr.bf16.mxu0 %v2767_v24  ;;  %v2810_v24 = vld [vmem:[#allocation8 + $0x230] ss:$8 sps:$4 sm:$0xff]  }
 0x2cb   :  { %1707 = vmatpush1.bf16.msra.mxu0 %v2765_v26  ;;  %v2815_v26 = vld [vmem:[#allocation8 + $0x244] ss:$8 sps:$4 sm:$0xff]  }
 0x2cc   :  { %1708 = vmatprep.subr.bf16.mxu0 %v2770_v27  ;;  %v2813_v27 = vld [vmem:[#allocation8 + $0x240] ss:$8 sps:$4 sm:$0xff]  }
 0x2cf   :  { %1709 = vmatpush1.bf16.msra.mxu0 %v2768_v28  ;;  %v2818_v28 = vld [vmem:[#allocation8 + $0x254] ss:$8 sps:$4 sm:$0xff]  }
 0x2d0   :  { %1710 = vmatprep.subr.bf16.mxu0 %v2773_v30  ;;  %v2816_v30 = vld [vmem:[#allocation8 + $0x250] ss:$8 sps:$4 sm:$0xff]  }
 0x2d3   :  { %1711 = vmatpush1.bf16.msra.mxu0 %v2771_v31  ;;  %v2821_v31 = vld [vmem:[#allocation8 + $0x264] ss:$8 sps:$4 sm:$0xff]  }
 0x2d4   :  { %1712 = vmatprep.subr.bf16.mxu0 %v2776_v32  ;;  %v2819_v32 = vld [vmem:[#allocation8 + $0x260] ss:$8 sps:$4 sm:$0xff]  }
 0x2d7   :  { %1713 = vmatpush1.bf16.msra.mxu0 %v2774_v33  ;;  %v2824_v33 = vld [vmem:[#allocation8 + $0x274] ss:$8 sps:$4 sm:$0xff]  }
 0x2d8   :  { %1714 = vmatprep.subr.bf16.mxu0 %v2779_v34  ;;  %v2822_v34 = vld [vmem:[#allocation8 + $0x270] ss:$8 sps:$4 sm:$0xff]  }
 0x2db   :  { %1715 = vmatpush1.bf16.msra.mxu0 %v2777_v36  ;;  %v2827_v36 = vld [vmem:[#allocation8 + $0x284] ss:$8 sps:$4 sm:$0xff]  }
 0x2dc   :  { %1716 = vmatprep.subr.bf16.mxu0 %v2782_v38  ;;  %v2825_v38 = vld [vmem:[#allocation8 + $0x280] ss:$8 sps:$4 sm:$0xff]  }
 0x2df   :  { %1717 = vmatpush1.bf16.msra.mxu0 %v2780_v39  ;;  %v2830_v39 = vld [vmem:[#allocation8 + $0x294] ss:$8 sps:$4 sm:$0xff]  }
 0x2e0   :  { %1718 = vmatprep.subr.bf16.mxu0 %v2785_v40  ;;  %v2828_v40 = vld [vmem:[#allocation8 + $0x290] ss:$8 sps:$4 sm:$0xff]  }
 0x2e3   :  { %1719 = vmatpush1.bf16.msra.mxu0 %v2783_v41  ;;  %v2833_v41 = vld [vmem:[#allocation8 + $0x2a4] ss:$8 sps:$4 sm:$0xff]  }
 0x2e4   :  { %1720 = vmatprep.subr.bf16.mxu0 %v2788_v42  ;;  %v2831_v42 = vld [vmem:[#allocation8 + $0x2a0] ss:$8 sps:$4 sm:$0xff]  }
 0x2e7   :  { %1721 = vmatpush1.bf16.msra.mxu0 %v2786_v43  ;;  %v2836_v43 = vld [vmem:[#allocation8 + $0x2b4] ss:$8 sps:$4 sm:$0xff]  }
 0x2e8   :  { %1722 = vmatprep.subr.bf16.mxu0 %v2791_v44  ;;  %v2834_v44 = vld [vmem:[#allocation8 + $0x2b0] ss:$8 sps:$4 sm:$0xff]  }
 0x2eb   :  { %1723 = vmatpush1.bf16.msra.mxu0 %v2789_v45  ;;  %v2839_v45 = vld [vmem:[#allocation8 + $0x2c4] ss:$8 sps:$4 sm:$0xff]  }
 0x2ec   :  { %1724 = vmatprep.subr.bf16.mxu0 %v2794_v54  ;;  %v2837_v54 = vld [vmem:[#allocation8 + $0x2c0] ss:$8 sps:$4 sm:$0xff]  }
 0x2ef   :  { %1725 = vmatpush1.bf16.msra.mxu0 %v2792_v46  ;;  %v2842_v46 = vld [vmem:[#allocation8 + $0x2d4] ss:$8 sps:$4 sm:$0xff]  }
 0x2f0   :  { %1726 = vmatprep.subr.bf16.mxu0 %v2797_v47  ;;  %v2840_v47 = vld [vmem:[#allocation8 + $0x2d0] ss:$8 sps:$4 sm:$0xff]  }
 0x2f3   :  { %1727 = vmatpush1.bf16.msra.mxu0 %v2795_v48  ;;  %v2845_v48 = vld [vmem:[#allocation8 + $0x2e4] ss:$8 sps:$4 sm:$0xff]  }
 0x2f4   :  { %1728 = vmatprep.subr.bf16.mxu0 %v2800_v50  ;;  %v2846_v50 = vld [vmem:[#allocation8 + $0x2f0] ss:$8 sps:$4 sm:$0xff]  }
 0x2f7   :  { %1729 = vmatpush1.bf16.msra.mxu0 %v2798_v49  ;;  %v2843_v49 = vld [vmem:[#allocation8 + $0x2e0] ss:$8 sps:$4 sm:$0xff]  }
 0x2f8   :  { %1970 = vmatprep.subr.bf16.mxu0 %v2803_v51  ;;  %v2848_v51 = vld [vmem:[#allocation8 + $0x2f4] ss:$8 sps:$4 sm:$0xff]  }
 0x38d   :  { %v1460_v56 = vpop.f32.mrb[12].mxu0 }
 0x38e   :  { %v1461_v61 = vadd.f32 %v1460_v56, %v1261_v35  ;;  %v1462_v63 = vpop.f32.mrb[13].mxu0  ;;  %v2849_v35 = vld [vmem:[#allocation10 + $0x40] sm:$0xff]   ;;  %v2851_v56 = vld [vmem:[#allocation10 + $0x48] sm:$0xff]  }
 0x38f   :  { %v1463_v0 = vadd.f32 %v1462_v63, %v1265_v52  ;;  %v1464_v2 = vpop.f32.mrb[14].mxu0  ;;  %v2850_v52 = vld [vmem:[#allocation10] sm:$0xff]   ;;  %2488 = vmatprep.subr.bf16.mxu1 %v2849_v35  ;;  %v2854_v63 = vld [vmem:[#allocation10 + $0x10] sm:$0xff]  }
 0x390   :  { %v1467_v25 = vadd.f32 %v1461_v61, %v3275_v12  ;;  %v1465_v5 = vpop.f32.mrb[15].mxu0  ;;  %2489 = vmatpush3.bf16.msra.mxu1 %v2850_v52  ;;  %v2852_v61 = vld [vmem:[#allocation10 + $0x8] sm:$0xff]   ;;  %v1533_v2 = vrot.slane %v3263_v60, %v3248_v37 }
 0x391   :  { %v1468_v6 = vadd.f32 %v1463_v0, %v3277_v14  ;;  %2490 = vmatprep.subr.bf16.mxu1 %v2851_v56  ;;  %v2855_v0 = vld [vmem:[#allocation10 + $0x58] sm:$0xff]  }
 0x392   :  { %v1477_v8 = vmul.f32 %v1472_v62, %v1467_v25  ;;  %v2853_v62 = vld [vmem:[#allocation10 + $0x50] sm:$0xff]   ;;  %v1537_v25 = vrot.slane %v3265_v4, %v3248_v37  ;;  %v1758_v37 = vrot.slane %v3265_v4, %v3215_v13 }
 0x393   :  { %v1478_v10 = vmul.f32 %v1476_v1, %v1468_v6  ;;  %v2856_v1 = vld [vmem:[#allocation10 + $0x18] sm:$0xff]   ;;  %v1744_v6 = vrot.slane %v3263_v60, %v3212_v9 }
 0x394   :  { %v1487_v11 = vadd.f32 %v1482_v3, %v1477_v8  ;;  %2491 = vmatpush3.bf16.msra.mxu1 %v2852_v61 }
 0x395   :  { %v1488_v15 = vadd.f32 %v1486_v7, %v1478_v10  ;;  %2492 = vmatprep.subr.bf16.mxu1 %v2853_v62  ;;  %v1748_v10 = vrot.slane %v3265_v4, %v3212_v9  ;;  %v2861_v4 = vld [vmem:[#allocation10 + $0x70] sm:$0xff]   ;;  %v2217_v62 = vand.u32 127, %v355_v53 }
 0x396   :  { %v1491_v16 = vmul.f32 0.1, %v1487_v11  ;;  %vm1489_vm9 = vcmp.ge.f32.partialorder %v1487_v11, 0.0 }
 0x397   :  { %vm1490_vm10 = vcmp.ge.f32.partialorder %v1488_v15, 0.0  ;;  %v1492_v59 = vmul.f32 0.1, %v1488_v15  ;;  %vm2218_vm15 = vcmp.lt.s32.totalorder %v2217_v62, 9 }
 0x398   :  { %v3297_v17 = vsel %vm1489_vm9, %v1487_v11, %v1491_v16  ;;  %2493 = vmatpush3.bf16.msra.mxu1 %v2854_v63  ;;  %v1754_v16 = vrot.slane %v3263_v60, %v3215_v13  ;;  %v2857_v60 = vld [vmem:[#allocation10 + $0x60] sm:$0xff]   ;;  %v2860_v13 = vld [vmem:[#allocation10 + $0x28] sm:$0xff]  }
 0x399   :  { %v3299_v12 = vsel %vm1490_vm10, %v1488_v15, %v1492_v59  ;;  %v1495_v14 = vpack.c.bf16 %v3297_v17, %v3297_v17  ;;  %2494 = vmatprep.subr.bf16.mxu1 %v2855_v0 }
 0x39a   :  { %v1496_v18 = vpack.c.bf16 %v3299_v12, %v3299_v12 }
 0x39c   :  { %1730 = vmatprep.mubr.bf16.mxu0 %v1496_v18  ;;  %2495 = vmatpush3.bf16.msra.mxu1 %v2856_v1 }
 0x39d   :  { %1731 = vmatmul.mubr.bf16.vlgmr.msra.gmra.mrb[16].mxu0 %v1495_v14  ;;  %2496 = vmatprep.subr.bf16.mxu1 %v2857_v60 }
 0x39e   :  { %1971 = vmatpush1.bf16.msra.mxu0 %v2801_v19 }
 0x39f   :  { %1972 = vmatprep.subr.bf16.mxu0 %v2806_v29 }
 0x3a2   :  { %1973 = vmatpush1.bf16.msra.mxu0 %v2804_v20 }
 0x3a3   :  { %1974 = vmatprep.subr.bf16.mxu0 %v2809_v21 }
 0x3a6   :  { %1975 = vmatpush1.bf16.msra.mxu0 %v2807_v22 }
 0x3a7   :  { %1976 = vmatprep.subr.bf16.mxu0 %v2812_v23 }
 0x3aa   :  { %1977 = vmatpush1.bf16.msra.mxu0 %v2810_v24 }
 0x3ab   :  { %1978 = vmatprep.subr.bf16.mxu0 %v2815_v26  ;;  %v2858_v26 = vld [vmem:[#allocation10 + $0x20] sm:$0xff]  }
 0x3ac   :  { %2497 = vmatpush3.bf16.msra.mxu1 %v2858_v26 }
 0x3ae   :  { %1979 = vmatpush1.bf16.msra.mxu0 %v2813_v27  ;;  %v2862_v27 = vld [vmem:[#allocation10 + $0x30] sm:$0xff]  }
 0x3af   :  { %1980 = vmatprep.subr.bf16.mxu0 %v2818_v28  ;;  %v2863_v28 = vld [vmem:[#allocation10 + $0x78] sm:$0xff]  }
 0x3b2   :  { %1981 = vmatpush1.bf16.msra.mxu0 %v2816_v30  ;;  %v2864_v30 = vld [vmem:[#allocation10 + $0x38] sm:$0xff]  }
 0x3b3   :  { %1982 = vmatprep.subr.bf16.mxu0 %v2821_v31  ;;  %v115_v31 = vld [vmem:[#allocation11 + $0x10] sm:$0xff] }
 0x3b6   :  { %1983 = vmatpush1.bf16.msra.mxu0 %v2819_v32  ;;  %v116_v32 = vld [vmem:[#allocation11 + $0x18] sm:$0xff] }
 0x3b7   :  { %1984 = vmatprep.subr.bf16.mxu0 %v2824_v33  ;;  %v1805_v33 = vrot.slane %v115_v31, %v3183_v55 }
 0x3ba   :  { %1985 = vmatpush1.bf16.msra.mxu0 %v2822_v34  ;;  %v1809_v34 = vrot.slane %v116_v32, %v3183_v55 }
 0x3bb   :  { %1986 = vmatprep.subr.bf16.mxu0 %v2827_v36 }
 0x3be   :  { %1987 = vmatpush1.bf16.msra.mxu0 %v2825_v38 }
 0x3bf   :  { %1988 = vmatprep.subr.bf16.mxu0 %v2830_v39  ;;  %v2016_v39 = vrot.slane %v115_v31, %v3194_v58 }
 0x3c2   :  { %1989 = vmatpush1.bf16.msra.mxu0 %v2828_v40 }
 0x3c3   :  { %1990 = vmatprep.subr.bf16.mxu0 %v2833_v41 }
 0x3c6   :  { %1991 = vmatpush1.bf16.msra.mxu0 %v2831_v42  ;;  %v2020_v42 = vrot.slane %v116_v32, %v3194_v58 }
 0x3c7   :  { %1992 = vmatprep.subr.bf16.mxu0 %v2836_v43 }
 0x3ca   :  { %1993 = vmatpush1.bf16.msra.mxu0 %v2834_v44 }
 0x3cb   :  { %1994 = vmatprep.subr.bf16.mxu0 %v2839_v45  ;;  %v2026_v45 = vrot.slane %v115_v31, %v3191_v57 }
 0x3ce   :  { %1995 = vmatpush1.bf16.msra.mxu0 %v2837_v54 }
 0x3cf   :  { %1996 = vmatprep.subr.bf16.mxu0 %v2842_v46 }
 0x3d2   :  { %1997 = vmatpush1.bf16.msra.mxu0 %v2840_v47  ;;  %v2030_v47 = vrot.slane %v116_v32, %v3191_v57  ;;  %v2470_v57 = vld [vmem:[%s3348_s5] ss:$0 sm:$0xff]  ;;  %s3052_s5 = smov [#allocation13]  }
 0x3d3   :  { %1998 = vmatprep.subr.bf16.mxu0 %v2845_v48  ;;  %s2245_s16 = sshll.u32 %s3052_s5, 4  ;;  %s2246_s16 = int_to_ptr.vmem [resolvable:$true] %s2245_s16 }
 0x3d4   :  { %s3005_s17 = scalar_lea.vmem %s2246_s16, 128  ;;  %p3010_p7 = scmp.lt.s32.totalorder %s2246_s16, %s2246_s16 }
 0x3d5   :  { %p3006_p6 = scmp.ne.s32.totalorder %s2246_s16, %s3005_s17  ;;  %p3011_p8 = scmp.lt.s32.totalorder %s3005_s17, %s3005_s17 }
 0x3d6   :  { %1999 = vmatpush1.bf16.msra.mxu0 %v2843_v49 }
 0x3d7   :  { %2000 = vmatprep.subr.bf16.mxu0 %v2848_v51  ;;  %p3012_p9 = por %p3011_p8, %p3010_p7 }
 0x3d9   :  { %p3013_p10 = pnand %p3012_p9, %p3006_p6 }
 0x3da   :  { %2001 = vmatpush1.bf16.msra.mxu0 %v2846_v50 }
 0x470   :  { %v1732_v3 = vpop.f32.mrb[16].mxu0 }
 0x471   :  { %v1733_v5 = vadd.f32 %v1732_v3, %v1533_v2  ;;  %v1734_v7 = vpop.f32.mrb[17].mxu0 }
 0x472   :  { %v1735_v8 = vadd.f32 %v1734_v7, %v1537_v25  ;;  %v1736_v11 = vpop.f32.mrb[18].mxu0 }
 0x473   :  { %v1739_v15 = vadd.f32 %v1733_v5, %v3297_v17  ;;  %v1737_v59 = vpop.f32.mrb[19].mxu0 }
 0x474   :  { %v1740_v18 = vadd.f32 %v1735_v8, %v3299_v12  ;;  %v2859_v12 = vld [vmem:[#allocation10 + $0x68] sm:$0xff]  }
 0x475   :  { %v1749_v19 = vmul.f32 %v1744_v6, %v1739_v15  ;;  %2498 = vmatprep.subr.bf16.mxu1 %v2859_v12 }
 0x476   :  { %v1750_v14 = vmul.f32 %v1748_v10, %v1740_v18  ;;  %2499 = vmatpush3.bf16.msra.mxu1 %v2860_v13 }
 0x477   :  { %v1759_v29 = vadd.f32 %v1754_v16, %v1749_v19  ;;  %2500 = vmatprep.subr.bf16.mxu1 %v2861_v4 }
 0x478   :  { %v1760_v20 = vadd.f32 %v1758_v37, %v1750_v14 }
 0x479   :  { %v1763_v21 = vmul.f32 0.1, %v1759_v29  ;;  %vm1761_vm11 = vcmp.ge.f32.partialorder %v1759_v29, 0.0 }
 0x47a   :  { %vm1762_vm12 = vcmp.ge.f32.partialorder %v1760_v20, 0.0  ;;  %v1764_v9 = vmul.f32 0.1, %v1760_v20  ;;  %2501 = vmatpush3.bf16.msra.mxu1 %v2862_v27 }
 0x47b   :  { %v1765_v22 = vsel %vm1761_vm11, %v1759_v29, %v1763_v21  ;;  %2502 = vmatprep.subr.bf16.mxu1 %v2863_v28 }
 0x47c   :  { %v1766_v23 = vsel %vm1762_vm12, %v1760_v20, %v1764_v9  ;;  %v1767_v24 = vpack.c.bf16 %v1765_v22, %v1765_v22 }
 0x47d   :  { %v1768_v17 = vpack.c.bf16 %v1766_v23, %v1766_v23 }
 0x47e   :  { %2503 = vmatpush3.bf16.msra.mxu1 %v2864_v30 }
 0x47f   :  { %2002 = vmatprep.mubr.bf16.mxu0 %v1768_v17 }
 0x480   :  { %2003 = vmatmul.mubr.bf16.vlgmr.msra.gmra.mrb[20].mxu0 %v1767_v24 }
 0x553   :  { %v2004_v36 = vpop.f32.mrb[20].mxu0 }
 0x554   :  { %v2005_v38 = vadd.f32 %v2004_v36, %v1805_v33  ;;  %v2006_v40 = vpop.f32.mrb[21].mxu0 }
 0x555   :  { %v2007_v41 = vadd.f32 %v2006_v40, %v1809_v34  ;;  %v2008_v43 = vpop.f32.mrb[22].mxu0 }
 0x556   :  { %v2011_v44 = vadd.f32 %v2005_v38, %v1765_v22  ;;  %v2009_v54 = vpop.f32.mrb[23].mxu0 }
 0x557   :  { %v2012_v46 = vadd.f32 %v2007_v41, %v1766_v23 }
 0x558   :  { %v2021_v48 = vmul.f32 %v2016_v39, %v2011_v44 }
 0x559   :  { %v2022_v49 = vmul.f32 %v2020_v42, %v2012_v46 }
 0x55a   :  { %v2031_v50 = vadd.f32 %v2026_v45, %v2021_v48 }
 0x55b   :  { %v2032_v55 = vadd.f32 %v2030_v47, %v2022_v49 }
 0x55c   :  { %v2035_v51 = vmul.f32 0.1, %v2031_v50  ;;  %vm2033_vm13 = vcmp.ge.f32.partialorder %v2031_v50, 0.0 }
 0x55d   :  { %vm2034_vm14 = vcmp.ge.f32.partialorder %v2032_v55, 0.0  ;;  %v2036_v35 = vmul.f32 0.1, %v2032_v55 }
 0x55e   :  { %v2037_v52 = vsel %vm2033_vm13, %v2031_v50, %v2035_v51 }
 0x55f   :  { %v2038_v56 = vsel %vm2034_vm14, %v2032_v55, %v2036_v35  ;;  %v2039_v58 = vpack.c.bf16 %v2037_v52, %v2037_v52 }
 0x560   :  { %v2040_v61 = vpack.c.bf16 %v2038_v56, %v2038_v56 }
 0x562   :  { %2208 = vmatprep.mubr.bf16.mxu1 %v2040_v61 }
 0x563   :  { %2209 = vmatmul.mubr.bf16.vlgmr.msra.gmra.mrb[4].mxu1 %v2039_v58 }
 0x636   :  { %v2504_v63 = vpop.f32.mrb[4].mxu1 }
 0x637   :  { %v2505_v0 = vpop.f32.mrb[5].mxu1 }
 0x638   :  { %v2506_v1 = vadd.f32 %v2505_v0, %v2504_v63  ;;  %v2507_v2 = vpop.f32.mrb[6].mxu1 }
 0x639   :  { %v2508_v25 = vpop.f32.mrb[7].mxu1 }
 0x63a   :  { %v2211_v3 = vadd.f32 %v2506_v1, %v2470_v57 }
 0x63c   :  { %v2219_v5 = vsel %vm2218_vm15, %v2211_v3, -1e+30  ;;  %v2487_v53 = vmul.f32 -1.442695, %v2211_v3 }
 0x63d   :  { %2220 = vmax.xlane.f32.xlu0 %v2219_v5 }
 0x6ca   :  { %v2221_v6 = vpop.xlane.xlu0 %2220 }
 0x6cb   :  { %v2222_v7 = vsub.f32 %v2219_v5, %v2221_v6 }
 0x6cd   :  { %v2223_v8 = vmul.f32 1.442695, %v2222_v7 }
 0x6cf   :  { %2865 = vpow2.f32 %v2223_v8 }
 0x6d0   :  { %2867 = vpow2.f32 %v2487_v53 }
 0x6d9   :  { %v2866_v10 = vpop.eup %2865 }
 0x6da   :  { %2225 = vadd.xlane.f32.xlu0 %v2866_v10  ;;  %v2868_v11 = vpop.eup %2867 }
 0x6db   :  { %v2234_v16 = vadd.f32 1.0, %v2868_v11 }
 0x767   :  { %v2226_v15 = vpop.xlane.xlu0 %2225 }
 0x768   :  { %2869 = vlog2.f32 %v2226_v15 }
 0x769   :  { %2871 = vrcp.f32 %v2234_v16 }
 0x772   :  { %v2870_v59 = vpop.eup %2869 }
 0x773   :  { %v2228_v18 = vmul.f32 0.6931472, %v2870_v59  ;;  %v2872_v14 = vpop.eup %2871 }
 0x775   :  { %v2229_v37 = vadd.f32 %v2228_v18, %v2221_v6 }
 0x777   :  { %v2230_v19 = vsub.f32 %v2211_v3, %v2229_v37 }
 0x779   :  { %v2237_v29 = vsel %vm2218_vm15, %v2230_v19, %v2872_v14 }
 0x77a   :  { %2238 = vst [vmem:[#allocation13] sm:$0xff] %v2237_v29 }
 0x77b   :  { %3016 = shalt.err (!%p3013_p10)
}
 0x77c   :  { %s3017_s3 = scalar_lea.hbm %s3351_s8, 128 }
 0x77d   :  { %p3018_p11 = scmp.ne.s32.totalorder %s3351_s8, %s3017_s3  ;;  %p3021_p12 = scmp.lt.u32.totalorder %s3017_s3, %s3351_s8 }
 0x77f   :  { %p3023_p13 = pnand %p3021_p12, %p3018_p11 }
 0x781   :  { %3026 = shalt.err (!%p3023_p13)
}
 0x782   :  { %2248 = dma.vmem_to_hbm [thread:$0]  %s2246_s16, 128, %s3351_s8, [#allocation4]  }
 0x783   :  { %3035 = dma.done.wait [#allocation4], 128  }
 0x784   :  { %3036 = vsyncadd [#allocation4], 4294967168 }
 0x785   :  { %2252 = vsyncpa [#allocation3], 1 }
 0x786   :  { %2253 = vsyncpa [#allocation6], 1 }
 0x787   :  { %2254 = vsyncpa [#allocation9], 1 }
 0x788   :  { %2255 = vsyncpa [#allocation12], 1 }
 0x789   :  { %2256 = vsyncpa [#allocation4], 1 }

</bundles_post_ra>
